<compile_context>
chip_gen: v6e
topology: v6e:2x2x1
jax: 0.10.0
libtpu: 0.0.40
codegen_flags: <defaults>
</compile_context>

<pallas_src>
import functools
import math

import numpy as np
import jax
import jax.numpy as jnp
from jax import lax
from jax.experimental import pallas as pl
from jax.experimental.pallas import tpu as pltpu


def _layernorm(x, gamma, beta, eps=1e-5):
    mu = jnp.mean(x, axis=-1, keepdims=True)
    var = jnp.mean((x - mu) ** 2, axis=-1, keepdims=True)
    return (x - mu) * lax.rsqrt(var + eps) * gamma + beta


def _gelu_exact(x):
    # PyTorch nn.GELU() default = exact erf-based GELU.
    return 0.5 * x * (1.0 + lax.erf(x * (1.0 / math.sqrt(2.0))))


def attention_block_kernel(
    xq_ref,               # (Tq, C)  query block of x (f32)
    xf_ref,               # (T,  C)  full-sequence x (f32), fetched once per batch
    wq_ref, bq_ref,       # (C, C) bf16 (pre-scaled by 1/sqrt(D)), (1, C) f32
    wkv_ref, bkv_ref,     # (C, 2C) bf16 = [Wk | Wv], (1, 2C) f32
    wp_ref, bp_ref,       # (C, C) bf16, (1, C) f32
    g1_ref, be1_ref,      # (1, C) f32
    w1_ref, b1_ref,       # (C, 4C) bf16, (1, 4C) f32
    w2_ref, b2_ref,       # (4C, C) bf16, (1, C) f32
    g2_ref, be2_ref,      # (1, C) f32
    o_ref,                # (Tq, C) f32
    k_sc, v_sc,           # VMEM scratch (H, T, D) bf16 — per-sequence K/V cache
    *, n_heads,
):
    f32 = jnp.float32
    bf16 = jnp.bfloat16
    Tq, C = xq_ref.shape
    T = xf_ref.shape[0]
    H = n_heads
    D = C // H
    qi = pl.program_id(1)

    # ---- K/V: one wide lane-dense (T,C)x(C,2C) matmul, computed once per batch ----
    @pl.when(qi == 0)
    def _():
        xf = xf_ref[...].astype(bf16)
        kv = jnp.dot(xf, wkv_ref[...], preferred_element_type=f32) + bkv_ref[...]
        for h in range(H):                    # (T,2C) -> per-head (H,T,D) relayout
            k_sc[h] = kv[:, h * D:(h + 1) * D].astype(bf16)
            v_sc[h] = kv[:, C + h * D:C + (h + 1) * D].astype(bf16)

    # ---- Q: one wide lane-dense (Tq,C)x(C,C) matmul (attention scale folded in) ----
    xq = xq_ref[...]                                           # (Tq, C) f32
    qp = jnp.dot(xq.astype(bf16), wq_ref[...],
                 preferred_element_type=f32) + bq_ref[...]     # (Tq, C) f32
    qh = jnp.stack([qp[:, h * D:(h + 1) * D] for h in range(H)],
                   axis=0).astype(bf16)                        # (H, Tq, D)

    # ---- causal scores, head-batched: (H,Tq,D)x(H,T,D) -> (H,Tq,T) ----
    k = k_sc[...]
    v = v_sc[...]
    s = lax.dot_general(qh, k, (((2,), (2,)), ((0,), (0,))),
                        preferred_element_type=f32)            # (H, Tq, T)
    row = qi * Tq + lax.broadcasted_iota(jnp.int32, (Tq, T), 0)
    col = lax.broadcasted_iota(jnp.int32, (Tq, T), 1)
    s = jnp.where((row >= col)[None, :, :], s, f32(-1e30))     # finite, NaN-safe

    # ---- softmax (f32 stats); EUP reciprocal + 1 Newton step (exact) ----
    m = jnp.max(s, axis=-1, keepdims=True)
    p = jnp.exp(s - m)
    l = jnp.sum(p, axis=-1, keepdims=True)
    r = pl.reciprocal(l, approx=True)
    r = r * (2.0 - l * r)                    # Newton refinement -> f32-exact divide
    p = p * r

    # ---- P @ V, head-batched: (H,Tq,T)x(H,T,D) -> (H,Tq,D) ----
    a = lax.dot_general(p.astype(bf16), v, (((2,), (1,)), ((0,), (0,))),
                        preferred_element_type=f32)

    # ---- merge heads -> single K=C output projection ----
    merged = jnp.concatenate([a[h] for h in range(H)], axis=-1)    # (Tq, C) f32
    proj = jnp.dot(merged.astype(bf16), wp_ref[...],
                   preferred_element_type=f32) + bp_ref[...]
    # TODO(synk): training-mode dropout not implemented (eval-mode identity).

    # ---- residual + LayerNorm1 (f32) ----
    h1 = _layernorm(xq + proj, g1_ref[...], be1_ref[...])

    # ---- FFN: (Tq,C)x(C,4C) -> exact GELU -> (Tq,4C)x(4C,C), bf16 operands ----
    ff = jnp.dot(h1.astype(bf16), w1_ref[...],
                 preferred_element_type=f32) + b1_ref[...]
    ff = _gelu_exact(ff)
    ff = jnp.dot(ff.astype(bf16), w2_ref[...],
                 preferred_element_type=f32) + b2_ref[...]

    # ---- residual + LayerNorm2 ----
    o_ref[...] = _layernorm(h1 + ff, g2_ref[...], be2_ref[...])


def pack_params(params, n_heads):
    """One-time weight repack: call at parameter-load time, NOT per forward call.
    params = [wq, bq, wk, bk, wv, bv, wp, bp, g1, be1, w1, b1, w2, b2, g2, be2];
    linear weights stored (in, out) so y = x @ W + b."""
    (wq, bq, wk, bk, wv, bv, wp, bp, g1, be1, w1, b1, w2, b2, g2, be2) = params
    C = wq.shape[0]
    D = C // n_heads
    scale = 1.0 / math.sqrt(D)
    bf16, f32 = jnp.bfloat16, jnp.float32
    wq_s = (wq * scale).astype(bf16)                        # fold 1/sqrt(D) into Q
    bq_s = (bq * scale).astype(f32)
    wkv = jnp.concatenate([wk, wv], axis=1).astype(bf16)    # (C, 2C) = [Wk | Wv]
    bkv = jnp.concatenate([bk, bv], axis=1).astype(f32)     # (1, 2C)
    return [wq_s, bq_s, wkv, bkv,
            wp.astype(bf16), bp.astype(f32),
            g1.astype(f32), be1.astype(f32),
            w1.astype(bf16), b1.astype(f32),
            w2.astype(bf16), b2.astype(f32),
            g2.astype(f32), be2.astype(f32)]


def attention_block(x, packed_params, n_heads, block_q=None):
    B, T, C = x.shape
    H = n_heads
    D = C // H

    if block_q is None:
        block_q = min(T, 128)
    if T % block_q != 0:
        block_q = T
    nq = T // block_q

    kparams = list(packed_params)
    # Constant index maps: parameter blocks never change across grid steps, so they
    # are fetched once and never re-DMAed.
    param_specs = [
        pl.BlockSpec(p.shape, lambda b, q, _nd=p.ndim: (0,) * _nd) for p in kparams
    ]
    xq_spec = pl.BlockSpec((pl.Squeezed(), block_q, C), lambda b, q: (b, q, 0))
    xf_spec = pl.BlockSpec((pl.Squeezed(), T, C), lambda b, q: (b, 0, 0))
    out_spec = pl.BlockSpec((pl.Squeezed(), block_q, C), lambda b, q: (b, q, 0))

    # Explicit VMEM budget: double-buffered params + x/out blocks + K/V scratch +
    # live activations (scores dominate) + headroom.  Handles v5e's 16 MiB default
    # and stays under v7x's 64 MiB physical limit.
    pbytes = sum(int(p.size) * p.dtype.itemsize for p in kparams)
    act_bytes = 4 * (2 * block_q * C + T * C + H * block_q * T
                     + 3 * block_q * C + block_q * 4 * C)
    scr_bytes = 2 * H * T * D * 2
    vmem_limit = int(min(max(2 * pbytes + 2 * act_bytes + scr_bytes + (8 << 20),
                             32 << 20), 64 << 20))

    return pl.pallas_call(
        functools.partial(attention_block_kernel, n_heads=n_heads),
        out_shape=jax.ShapeDtypeStruct((B, T, C), jnp.float32),
        grid_spec=pltpu.PrefetchScalarGridSpec(
            num_scalar_prefetch=0,
            grid=(B, nq),                      # batch parallel, q-blocks sequential
            in_specs=[xq_spec, xf_spec] + param_specs,
            out_specs=out_spec,
            scratch_shapes=[pltpu.VMEM((H, T, D), jnp.bfloat16),
                            pltpu.VMEM((H, T, D), jnp.bfloat16)],
        ),
        compiler_params=pltpu.CompilerParams(
            dimension_semantics=("parallel", "arbitrary"),
            vmem_limit_bytes=vmem_limit,
        ),
    )(x, x, *kparams)


# ----------------------------- pure-JAX reference -----------------------------
def reference(x, params, n_heads):
    (wq, bq, wk, bk, wv, bv, wp, bp, g1, be1, w1, b1, w2, b2, g2, be2) = params
    B, T, C = x.shape
    D = C // n_heads

    def lin(v, w, b):
        return v @ w + b

    Q = lin(x, wq, bq).reshape(B, T, n_heads, D).transpose(0, 2, 1, 3)
    K = lin(x, wk, bk).reshape(B, T, n_heads, D).transpose(0, 2, 1, 3)
    V = lin(x, wv, bv).reshape(B, T, n_heads, D).transpose(0, 2, 1, 3)
    w = jnp.einsum("bhtd,bhsd->bhts", Q, K) / math.sqrt(D)
    mask = jnp.tril(jnp.ones((T, T)))[None, None]
    w = jnp.where(mask == 0, -jnp.inf, w)
    w = jax.nn.softmax(w, axis=-1)
    A = jnp.einsum("bhts,bhsd->bhtd", w, V).transpose(0, 2, 1, 3).reshape(B, T, C)
    attn = lin(A, wp, bp)

    def ln(v, g, b, eps=1e-5):
        mu = v.mean(-1, keepdims=True)
        var = ((v - mu) ** 2).mean(-1, keepdims=True)
        return (v - mu) / jnp.sqrt(var + eps) * g + b

    h1 = ln(x + attn, g1, be1)
    ff = lin(h1, w1, b1)
    ff = 0.5 * ff * (1.0 + lax.erf(ff / math.sqrt(2.0)))
    ff = lin(ff, w2, b2)
    return ln(h1 + ff, g2, be2)


if __name__ == "__main__":
    B, T, C, n_heads = 2, 8, 32, 4   # h_dim=32, max_T=8, n_heads=4; dropout = eval identity
    key = jax.random.PRNGKey(0)
    keys = jax.random.split(key, 8)

    def w(k, shp):
        return (0.02 * jax.random.normal(k, shp)).astype(jnp.float32)

    params = [
        w(keys[0], (C, C)), jnp.zeros((1, C), jnp.float32),               # Q
        w(keys[1], (C, C)), jnp.zeros((1, C), jnp.float32),               # K
        w(keys[2], (C, C)), jnp.zeros((1, C), jnp.float32),               # V
        w(keys[3], (C, C)), jnp.zeros((1, C), jnp.float32),               # proj
        jnp.ones((1, C), jnp.float32), jnp.zeros((1, C), jnp.float32),    # norm1
        w(keys[4], (C, 4 * C)), jnp.zeros((1, 4 * C), jnp.float32),       # ffn fc1
        w(keys[5], (4 * C, C)), jnp.zeros((1, C), jnp.float32),           # ffn fc2
        jnp.ones((1, C), jnp.float32), jnp.zeros((1, C), jnp.float32),    # norm2
    ]
    x = jax.random.normal(keys[6], (B, T, C), dtype=jnp.float32)

    packed = pack_params(params, n_heads)        # one-time repack, outside hot path
    out = attention_block(x, packed, n_heads)
    out = jax.block_until_ready(out)

    ref = reference(x, params, n_heads)
    # Tolerance reflects bf16 matmul operands (f32 accumulation, f32 LN/softmax stats).
    np.testing.assert_allclose(np.asarray(out), np.asarray(ref), rtol=2e-2, atol=2e-2)
    print("KERNEL_OK")
</pallas_src>

<mosaic_0001>
module attributes {stable_mosaic.version = 11 : i64} {
  func.func @attention_block_kernel(%arg0: i32, %arg1: i32, %arg2: memref<1x8x32xf32, #tpu.memory_space<vmem>>, %arg3: memref<1x8x32xf32, #tpu.memory_space<vmem>>, %arg4: memref<32x32xbf16, #tpu.memory_space<vmem>>, %arg5: memref<1x32xf32, #tpu.memory_space<vmem>>, %arg6: memref<32x64xbf16, #tpu.memory_space<vmem>>, %arg7: memref<1x64xf32, #tpu.memory_space<vmem>>, %arg8: memref<32x32xbf16, #tpu.memory_space<vmem>>, %arg9: memref<1x32xf32, #tpu.memory_space<vmem>>, %arg10: memref<1x32xf32, #tpu.memory_space<vmem>>, %arg11: memref<1x32xf32, #tpu.memory_space<vmem>>, %arg12: memref<32x128xbf16, #tpu.memory_space<vmem>>, %arg13: memref<1x128xf32, #tpu.memory_space<vmem>>, %arg14: memref<128x32xbf16, #tpu.memory_space<vmem>>, %arg15: memref<1x32xf32, #tpu.memory_space<vmem>>, %arg16: memref<1x32xf32, #tpu.memory_space<vmem>>, %arg17: memref<1x32xf32, #tpu.memory_space<vmem>>, %arg18: memref<1x8x32xf32, #tpu.memory_space<vmem>>, %arg19: memref<4x8x8xbf16, #tpu.memory_space<vmem>>, %arg20: memref<4x8x8xbf16, #tpu.memory_space<vmem>>) attributes {dimension_semantics = [#tpu.dimension_semantics<parallel>, #tpu.dimension_semantics<arbitrary>], iteration_bounds = array<i64: 2, 1>, scalar_prefetch = 0 : i64, scratch_operands = 2 : i64, tpu.core_type = #tpu.core_type<tc>, window_params = [{transform_indices = @transform_0, window_bounds = array<i64: 1, 8, 32>}, {transform_indices = @transform_1, window_bounds = array<i64: 1, 8, 32>}, {pipeline_mode = #tpu.pipeline_mode<synchronous>, transform_indices = @transform_2, window_bounds = array<i64: 32, 32>}, {pipeline_mode = #tpu.pipeline_mode<synchronous>, transform_indices = @transform_3, window_bounds = array<i64: 1, 32>}, {pipeline_mode = #tpu.pipeline_mode<synchronous>, transform_indices = @transform_4, window_bounds = array<i64: 32, 64>}, {pipeline_mode = #tpu.pipeline_mode<synchronous>, transform_indices = @transform_5, window_bounds = array<i64: 1, 64>}, {pipeline_mode = #tpu.pipeline_mode<synchronous>, transform_indices = @transform_6, window_bounds = array<i64: 32, 32>}, {pipeline_mode = #tpu.pipeline_mode<synchronous>, transform_indices = @transform_7, window_bounds = array<i64: 1, 32>}, {pipeline_mode = #tpu.pipeline_mode<synchronous>, transform_indices = @transform_8, window_bounds = array<i64: 1, 32>}, {pipeline_mode = #tpu.pipeline_mode<synchronous>, transform_indices = @transform_9, window_bounds = array<i64: 1, 32>}, {pipeline_mode = #tpu.pipeline_mode<synchronous>, transform_indices = @transform_10, window_bounds = array<i64: 32, 128>}, {pipeline_mode = #tpu.pipeline_mode<synchronous>, transform_indices = @transform_11, window_bounds = array<i64: 1, 128>}, {pipeline_mode = #tpu.pipeline_mode<synchronous>, transform_indices = @transform_12, window_bounds = array<i64: 128, 32>}, {pipeline_mode = #tpu.pipeline_mode<synchronous>, transform_indices = @transform_13, window_bounds = array<i64: 1, 32>}, {pipeline_mode = #tpu.pipeline_mode<synchronous>, transform_indices = @transform_14, window_bounds = array<i64: 1, 32>}, {pipeline_mode = #tpu.pipeline_mode<synchronous>, transform_indices = @transform_15, window_bounds = array<i64: 1, 32>}, {transform_indices = @transform_16, window_bounds = array<i64: 1, 8, 32>}]} {
    %c0_i32 = arith.constant 0 : i32
    %0 = arith.cmpi eq, %arg1, %c0_i32 : i32
    %1 = arith.extui %0 : i1 to i32
    %c0_i32_0 = arith.constant 0 : i32
    %2 = arith.cmpi ne, %1, %c0_i32_0 : i32
    scf.if %2 {
      %c0_58 = arith.constant 0 : index
      %c0_59 = arith.constant 0 : index
      %c0_60 = arith.constant 0 : index
      %139 = vector.load %arg3[%c0_58, %c0_59, %c0_60] : memref<1x8x32xf32, #tpu.memory_space<vmem>>, vector<1x8x32xf32>
      %140 = vector.shape_cast %139 : vector<1x8x32xf32> to vector<8x32xf32>
      %141 = arith.truncf %140 : vector<8x32xf32> to vector<8x32xbf16>
      %c0_61 = arith.constant 0 : index
      %c0_62 = arith.constant 0 : index
      %142 = vector.load %arg6[%c0_61, %c0_62] : memref<32x64xbf16, #tpu.memory_space<vmem>>, vector<32x64xbf16>
      %cst_63 = arith.constant dense<0.000000e+00> : vector<8x64xf32>
      %143 = tpu.matmul %141, %142, %cst_63 {dimension_numbers = #tpu.dot_dimension_numbers<[1], [0], [0], [1], [0, 0, 1, 1], [], []>} : vector<8x32xbf16>, vector<32x64xbf16>, vector<8x64xf32> -> vector<8x64xf32>
      %c0_64 = arith.constant 0 : index
      %c0_65 = arith.constant 0 : index
      %144 = vector.load %arg7[%c0_64, %c0_65] : memref<1x64xf32, #tpu.memory_space<vmem>>, vector<1x64xf32>
      %145 = vector.broadcast %144 : vector<1x64xf32> to vector<8x64xf32>
      %146 = arith.addf %143, %145 : vector<8x64xf32>
      %147 = vector.extract_strided_slice %146 {offsets = [0, 0], sizes = [8, 8], strides = [1, 1]} : vector<8x64xf32> to vector<8x8xf32>
      %148 = arith.truncf %147 : vector<8x8xf32> to vector<8x8xbf16>
      %c0_66 = arith.constant 0 : index
      %c0_67 = arith.constant 0 : index
      %c0_68 = arith.constant 0 : index
      %149 = vector.load %arg19[%c0_66, %c0_67, %c0_68] : memref<4x8x8xbf16, #tpu.memory_space<vmem>>, vector<1x8x8xbf16>
      %150 = vector.shape_cast %149 : vector<1x8x8xbf16> to vector<8x8xbf16>
      %151 = vector.shape_cast %148 : vector<8x8xbf16> to vector<1x8x8xbf16>
      tpu.vector_store %arg19[%c0_66, %c0_67, %c0_68], %151 {strides = array<i32>} : memref<4x8x8xbf16, #tpu.memory_space<vmem>>, vector<1x8x8xbf16>,
      %152 = vector.extract_strided_slice %146 {offsets = [0, 32], sizes = [8, 8], strides = [1, 1]} : vector<8x64xf32> to vector<8x8xf32>
      %153 = arith.truncf %152 : vector<8x8xf32> to vector<8x8xbf16>
      %c0_69 = arith.constant 0 : index
      %c0_70 = arith.constant 0 : index
      %c0_71 = arith.constant 0 : index
      %154 = vector.load %arg20[%c0_69, %c0_70, %c0_71] : memref<4x8x8xbf16, #tpu.memory_space<vmem>>, vector<1x8x8xbf16>
      %155 = vector.shape_cast %154 : vector<1x8x8xbf16> to vector<8x8xbf16>
      %156 = vector.shape_cast %153 : vector<8x8xbf16> to vector<1x8x8xbf16>
      tpu.vector_store %arg20[%c0_69, %c0_70, %c0_71], %156 {strides = array<i32>} : memref<4x8x8xbf16, #tpu.memory_space<vmem>>, vector<1x8x8xbf16>,
      %157 = vector.extract_strided_slice %146 {offsets = [0, 8], sizes = [8, 8], strides = [1, 1]} : vector<8x64xf32> to vector<8x8xf32>
      %158 = arith.truncf %157 : vector<8x8xf32> to vector<8x8xbf16>
      %c1 = arith.constant 1 : index
      %c0_72 = arith.constant 0 : index
      %c0_73 = arith.constant 0 : index
      %159 = vector.load %arg19[%c1, %c0_72, %c0_73] : memref<4x8x8xbf16, #tpu.memory_space<vmem>>, vector<1x8x8xbf16>
      %160 = vector.shape_cast %159 : vector<1x8x8xbf16> to vector<8x8xbf16>
      %161 = vector.shape_cast %158 : vector<8x8xbf16> to vector<1x8x8xbf16>
      tpu.vector_store %arg19[%c1, %c0_72, %c0_73], %161 {strides = array<i32>} : memref<4x8x8xbf16, #tpu.memory_space<vmem>>, vector<1x8x8xbf16>,
      %162 = vector.extract_strided_slice %146 {offsets = [0, 40], sizes = [8, 8], strides = [1, 1]} : vector<8x64xf32> to vector<8x8xf32>
      %163 = arith.truncf %162 : vector<8x8xf32> to vector<8x8xbf16>
      %c1_74 = arith.constant 1 : index
      %c0_75 = arith.constant 0 : index
      %c0_76 = arith.constant 0 : index
      %164 = vector.load %arg20[%c1_74, %c0_75, %c0_76] : memref<4x8x8xbf16, #tpu.memory_space<vmem>>, vector<1x8x8xbf16>
      %165 = vector.shape_cast %164 : vector<1x8x8xbf16> to vector<8x8xbf16>
      %166 = vector.shape_cast %163 : vector<8x8xbf16> to vector<1x8x8xbf16>
      tpu.vector_store %arg20[%c1_74, %c0_75, %c0_76], %166 {strides = array<i32>} : memref<4x8x8xbf16, #tpu.memory_space<vmem>>, vector<1x8x8xbf16>,
      %167 = vector.extract_strided_slice %146 {offsets = [0, 16], sizes = [8, 8], strides = [1, 1]} : vector<8x64xf32> to vector<8x8xf32>
      %168 = arith.truncf %167 : vector<8x8xf32> to vector<8x8xbf16>
      %c2 = arith.constant 2 : index
      %c0_77 = arith.constant 0 : index
      %c0_78 = arith.constant 0 : index
      %169 = vector.load %arg19[%c2, %c0_77, %c0_78] : memref<4x8x8xbf16, #tpu.memory_space<vmem>>, vector<1x8x8xbf16>
      %170 = vector.shape_cast %169 : vector<1x8x8xbf16> to vector<8x8xbf16>
      %171 = vector.shape_cast %168 : vector<8x8xbf16> to vector<1x8x8xbf16>
      tpu.vector_store %arg19[%c2, %c0_77, %c0_78], %171 {strides = array<i32>} : memref<4x8x8xbf16, #tpu.memory_space<vmem>>, vector<1x8x8xbf16>,
      %172 = vector.extract_strided_slice %146 {offsets = [0, 48], sizes = [8, 8], strides = [1, 1]} : vector<8x64xf32> to vector<8x8xf32>
      %173 = arith.truncf %172 : vector<8x8xf32> to vector<8x8xbf16>
      %c2_79 = arith.constant 2 : index
      %c0_80 = arith.constant 0 : index
      %c0_81 = arith.constant 0 : index
      %174 = vector.load %arg20[%c2_79, %c0_80, %c0_81] : memref<4x8x8xbf16, #tpu.memory_space<vmem>>, vector<1x8x8xbf16>
      %175 = vector.shape_cast %174 : vector<1x8x8xbf16> to vector<8x8xbf16>
      %176 = vector.shape_cast %173 : vector<8x8xbf16> to vector<1x8x8xbf16>
      tpu.vector_store %arg20[%c2_79, %c0_80, %c0_81], %176 {strides = array<i32>} : memref<4x8x8xbf16, #tpu.memory_space<vmem>>, vector<1x8x8xbf16>,
      %177 = vector.extract_strided_slice %146 {offsets = [0, 24], sizes = [8, 8], strides = [1, 1]} : vector<8x64xf32> to vector<8x8xf32>
      %178 = arith.truncf %177 : vector<8x8xf32> to vector<8x8xbf16>
      %c3 = arith.constant 3 : index
      %c0_82 = arith.constant 0 : index
      %c0_83 = arith.constant 0 : index
      %179 = vector.load %arg19[%c3, %c0_82, %c0_83] : memref<4x8x8xbf16, #tpu.memory_space<vmem>>, vector<1x8x8xbf16>
      %180 = vector.shape_cast %179 : vector<1x8x8xbf16> to vector<8x8xbf16>
      %181 = vector.shape_cast %178 : vector<8x8xbf16> to vector<1x8x8xbf16>
      tpu.vector_store %arg19[%c3, %c0_82, %c0_83], %181 {strides = array<i32>} : memref<4x8x8xbf16, #tpu.memory_space<vmem>>, vector<1x8x8xbf16>,
      %182 = vector.extract_strided_slice %146 {offsets = [0, 56], sizes = [8, 8], strides = [1, 1]} : vector<8x64xf32> to vector<8x8xf32>
      %183 = arith.truncf %182 : vector<8x8xf32> to vector<8x8xbf16>
      %c3_84 = arith.constant 3 : index
      %c0_85 = arith.constant 0 : index
      %c0_86 = arith.constant 0 : index
      %184 = vector.load %arg20[%c3_84, %c0_85, %c0_86] : memref<4x8x8xbf16, #tpu.memory_space<vmem>>, vector<1x8x8xbf16>
      %185 = vector.shape_cast %184 : vector<1x8x8xbf16> to vector<8x8xbf16>
      %186 = vector.shape_cast %183 : vector<8x8xbf16> to vector<1x8x8xbf16>
      tpu.vector_store %arg20[%c3_84, %c0_85, %c0_86], %186 {strides = array<i32>} : memref<4x8x8xbf16, #tpu.memory_space<vmem>>, vector<1x8x8xbf16>,
    } else {
    }
    %c0 = arith.constant 0 : index
    %c0_1 = arith.constant 0 : index
    %c0_2 = arith.constant 0 : index
    %3 = vector.load %arg2[%c0, %c0_1, %c0_2] : memref<1x8x32xf32, #tpu.memory_space<vmem>>, vector<1x8x32xf32>
    %4 = vector.shape_cast %3 : vector<1x8x32xf32> to vector<8x32xf32>
    %5 = arith.truncf %4 : vector<8x32xf32> to vector<8x32xbf16>
    %c0_3 = arith.constant 0 : index
    %c0_4 = arith.constant 0 : index
    %6 = vector.load %arg4[%c0_3, %c0_4] : memref<32x32xbf16, #tpu.memory_space<vmem>>, vector<32x32xbf16>
    %cst = arith.constant dense<0.000000e+00> : vector<8x32xf32>
    %7 = tpu.matmul %5, %6, %cst {dimension_numbers = #tpu.dot_dimension_numbers<[1], [0], [0], [1], [0, 0, 1, 1], [], []>} : vector<8x32xbf16>, vector<32x32xbf16>, vector<8x32xf32> -> vector<8x32xf32>
    %c0_5 = arith.constant 0 : index
    %c0_6 = arith.constant 0 : index
    %8 = vector.load %arg5[%c0_5, %c0_6] : memref<1x32xf32, #tpu.memory_space<vmem>>, vector<1x32xf32>
    %9 = vector.broadcast %8 : vector<1x32xf32> to vector<8x32xf32>
    %10 = arith.addf %7, %9 : vector<8x32xf32>
    %11 = vector.extract_strided_slice %10 {offsets = [0, 0], sizes = [8, 8], strides = [1, 1]} : vector<8x32xf32> to vector<8x8xf32>
    %12 = vector.extract_strided_slice %10 {offsets = [0, 8], sizes = [8, 8], strides = [1, 1]} : vector<8x32xf32> to vector<8x8xf32>
    %13 = vector.extract_strided_slice %10 {offsets = [0, 16], sizes = [8, 8], strides = [1, 1]} : vector<8x32xf32> to vector<8x8xf32>
    %14 = vector.extract_strided_slice %10 {offsets = [0, 24], sizes = [8, 8], strides = [1, 1]} : vector<8x32xf32> to vector<8x8xf32>
    %15 = vector.shape_cast %11 : vector<8x8xf32> to vector<1x8x8xf32>
    %16 = vector.shape_cast %12 : vector<8x8xf32> to vector<1x8x8xf32>
    %17 = vector.shape_cast %13 : vector<8x8xf32> to vector<1x8x8xf32>
    %18 = vector.shape_cast %14 : vector<8x8xf32> to vector<1x8x8xf32>
    %19 = tpu.concatenate %15, %16, %17, %18 in 0 : vector<1x8x8xf32>, vector<1x8x8xf32>, vector<1x8x8xf32>, vector<1x8x8xf32> -> vector<4x8x8xf32>
    %20 = arith.truncf %19 : vector<4x8x8xf32> to vector<4x8x8xbf16>
    %c0_7 = arith.constant 0 : index
    %c0_8 = arith.constant 0 : index
    %c0_9 = arith.constant 0 : index
    %21 = vector.load %arg19[%c0_7, %c0_8, %c0_9] : memref<4x8x8xbf16, #tpu.memory_space<vmem>>, vector<4x8x8xbf16>
    %c0_10 = arith.constant 0 : index
    %c0_11 = arith.constant 0 : index
    %c0_12 = arith.constant 0 : index
    %22 = vector.load %arg20[%c0_10, %c0_11, %c0_12] : memref<4x8x8xbf16, #tpu.memory_space<vmem>>, vector<4x8x8xbf16>
    %cst_13 = arith.constant dense<0.000000e+00> : vector<4x8x8xf32>
    %23 = tpu.matmul %20, %21, %cst_13 {dimension_numbers = #tpu.dot_dimension_numbers<[2], [2], [1], [1], [0, 0, 0, 1, 1, 1], [0], [0]>} : vector<4x8x8xbf16>, vector<4x8x8xbf16>, vector<4x8x8xf32> -> vector<4x8x8xf32>
    %c8_i32 = arith.constant 8 : i32
    %24 = arith.muli %arg1, %c8_i32 : i32
    %25 = tpu.iota {dimensions = array<i32: 0>} : vector<8x8xi32>
    %26 = vector.broadcast %24 : i32 to vector<8x8xi32>
    %27 = arith.addi %26, %25 : vector<8x8xi32>
    %28 = tpu.iota {dimensions = array<i32: 1>} : vector<8x8xi32>
    %29 = arith.cmpi sge, %27, %28 : vector<8x8xi32>
    %30 = vector.shape_cast %29 : vector<8x8xi1> to vector<1x8x8xi1>
    %cst_14 = arith.constant -1.000000e+30 : f32
    %31 = vector.shape_cast %30 : vector<1x8x8xi1> to vector<1x8x8xi1>
    %32 = vector.broadcast %31 : vector<1x8x8xi1> to vector<4x8x8xi1>
    %33 = vector.broadcast %cst_14 : f32 to vector<4x8x8xf32>
    %34 = arith.select %32, %23, %33 : vector<4x8x8xi1>, vector<4x8x8xf32>
    %cst_15 = arith.constant dense<0xFF800000> : vector<4x8xf32>
    %35 = vector.multi_reduction <maximumf>, %34, %cst_15 [2] : vector<4x8x8xf32> to vector<4x8xf32>
    %36 = vector.shape_cast %35 : vector<4x8xf32> to vector<4x8x1xf32>
    %37 = vector.broadcast %36 : vector<4x8x1xf32> to vector<4x8x8xf32>
    %38 = arith.subf %34, %37 : vector<4x8x8xf32>
    %39 = math.exp %38 : vector<4x8x8xf32>
    %cst_16 = arith.constant dense<0.000000e+00> : vector<4x8xf32>
    %40 = vector.multi_reduction <add>, %39, %cst_16 [2] : vector<4x8x8xf32> to vector<4x8xf32>
    %41 = vector.shape_cast %40 : vector<4x8xf32> to vector<4x8x1xf32>
    %42 = tpu.reciprocal %41 {approx = true} : vector<4x8x1xf32> -> vector<4x8x1xf32>
    %43 = arith.mulf %41, %42 : vector<4x8x1xf32>
    %cst_17 = arith.constant 2.000000e+00 : f32
    %44 = vector.broadcast %cst_17 : f32 to vector<4x8x1xf32>
    %45 = arith.subf %44, %43 : vector<4x8x1xf32>
    %46 = arith.mulf %42, %45 : vector<4x8x1xf32>
    %47 = vector.broadcast %46 : vector<4x8x1xf32> to vector<4x8x8xf32>
    %48 = arith.mulf %39, %47 : vector<4x8x8xf32>
    %49 = arith.truncf %48 : vector<4x8x8xf32> to vector<4x8x8xbf16>
    %cst_18 = arith.constant dense<0.000000e+00> : vector<4x8x8xf32>
    %50 = tpu.matmul %49, %22, %cst_18 {dimension_numbers = #tpu.dot_dimension_numbers<[2], [1], [1], [2], [0, 0, 0, 1, 1, 2], [0], [0]>} : vector<4x8x8xbf16>, vector<4x8x8xbf16>, vector<4x8x8xf32> -> vector<4x8x8xf32>
    %51 = vector.extract_strided_slice %50 {offsets = [0, 0, 0], sizes = [1, 8, 8], strides = [1, 1, 1]} : vector<4x8x8xf32> to vector<1x8x8xf32>
    %52 = vector.shape_cast %51 : vector<1x8x8xf32> to vector<8x8xf32>
    %53 = vector.extract_strided_slice %50 {offsets = [1, 0, 0], sizes = [1, 8, 8], strides = [1, 1, 1]} : vector<4x8x8xf32> to vector<1x8x8xf32>
    %54 = vector.shape_cast %53 : vector<1x8x8xf32> to vector<8x8xf32>
    %55 = vector.extract_strided_slice %50 {offsets = [2, 0, 0], sizes = [1, 8, 8], strides = [1, 1, 1]} : vector<4x8x8xf32> to vector<1x8x8xf32>
    %56 = vector.shape_cast %55 : vector<1x8x8xf32> to vector<8x8xf32>
    %57 = vector.extract_strided_slice %50 {offsets = [3, 0, 0], sizes = [1, 8, 8], strides = [1, 1, 1]} : vector<4x8x8xf32> to vector<1x8x8xf32>
    %58 = vector.shape_cast %57 : vector<1x8x8xf32> to vector<8x8xf32>
    %59 = tpu.concatenate %52, %54, %56, %58 in 1 : vector<8x8xf32>, vector<8x8xf32>, vector<8x8xf32>, vector<8x8xf32> -> vector<8x32xf32>
    %60 = arith.truncf %59 : vector<8x32xf32> to vector<8x32xbf16>
    %c0_19 = arith.constant 0 : index
    %c0_20 = arith.constant 0 : index
    %61 = vector.load %arg8[%c0_19, %c0_20] : memref<32x32xbf16, #tpu.memory_space<vmem>>, vector<32x32xbf16>
    %cst_21 = arith.constant dense<0.000000e+00> : vector<8x32xf32>
    %62 = tpu.matmul %60, %61, %cst_21 {dimension_numbers = #tpu.dot_dimension_numbers<[1], [0], [0], [1], [0, 0, 1, 1], [], []>} : vector<8x32xbf16>, vector<32x32xbf16>, vector<8x32xf32> -> vector<8x32xf32>
    %c0_22 = arith.constant 0 : index
    %c0_23 = arith.constant 0 : index
    %63 = vector.load %arg9[%c0_22, %c0_23] : memref<1x32xf32, #tpu.memory_space<vmem>>, vector<1x32xf32>
    %64 = vector.broadcast %63 : vector<1x32xf32> to vector<8x32xf32>
    %65 = arith.addf %62, %64 : vector<8x32xf32>
    %66 = arith.addf %4, %65 : vector<8x32xf32>
    %c0_24 = arith.constant 0 : index
    %c0_25 = arith.constant 0 : index
    %67 = vector.load %arg10[%c0_24, %c0_25] : memref<1x32xf32, #tpu.memory_space<vmem>>, vector<1x32xf32>
    %c0_26 = arith.constant 0 : index
    %c0_27 = arith.constant 0 : index
    %68 = vector.load %arg11[%c0_26, %c0_27] : memref<1x32xf32, #tpu.memory_space<vmem>>, vector<1x32xf32>
    %cst_28 = arith.constant dense<0.000000e+00> : vector<8xf32>
    %69 = vector.multi_reduction <add>, %66, %cst_28 [1] : vector<8x32xf32> to vector<8xf32>
    %70 = vector.shape_cast %69 : vector<8xf32> to vector<8x1xf32>
    %cst_29 = arith.constant 3.200000e+01 : f32
    %71 = vector.broadcast %cst_29 : f32 to vector<8x1xf32>
    %72 = arith.divf %70, %71 : vector<8x1xf32>
    %73 = vector.broadcast %72 : vector<8x1xf32> to vector<8x32xf32>
    %74 = arith.subf %66, %73 : vector<8x32xf32>
    %75 = arith.mulf %74, %74 : vector<8x32xf32>
    %cst_30 = arith.constant dense<0.000000e+00> : vector<8xf32>
    %76 = vector.multi_reduction <add>, %75, %cst_30 [1] : vector<8x32xf32> to vector<8xf32>
    %77 = vector.shape_cast %76 : vector<8xf32> to vector<8x1xf32>
    %cst_31 = arith.constant 3.200000e+01 : f32
    %78 = vector.broadcast %cst_31 : f32 to vector<8x1xf32>
    %79 = arith.divf %77, %78 : vector<8x1xf32>
    %80 = vector.broadcast %72 : vector<8x1xf32> to vector<8x32xf32>
    %81 = arith.subf %66, %80 : vector<8x32xf32>
    %cst_32 = arith.constant 9.99999974E-6 : f32
    %82 = vector.broadcast %cst_32 : f32 to vector<8x1xf32>
    %83 = arith.addf %79, %82 : vector<8x1xf32>
    %84 = math.rsqrt %83 : vector<8x1xf32>
    %85 = vector.broadcast %84 : vector<8x1xf32> to vector<8x32xf32>
    %86 = arith.mulf %81, %85 : vector<8x32xf32>
    %87 = vector.broadcast %67 : vector<1x32xf32> to vector<8x32xf32>
    %88 = arith.mulf %86, %87 : vector<8x32xf32>
    %89 = vector.broadcast %68 : vector<1x32xf32> to vector<8x32xf32>
    %90 = arith.addf %88, %89 : vector<8x32xf32>
    %91 = arith.truncf %90 : vector<8x32xf32> to vector<8x32xbf16>
    %c0_33 = arith.constant 0 : index
    %c0_34 = arith.constant 0 : index
    %92 = vector.load %arg12[%c0_33, %c0_34] : memref<32x128xbf16, #tpu.memory_space<vmem>>, vector<32x128xbf16>
    %cst_35 = arith.constant dense<0.000000e+00> : vector<8x128xf32>
    %93 = tpu.matmul %91, %92, %cst_35 {dimension_numbers = #tpu.dot_dimension_numbers<[1], [0], [0], [1], [0, 0, 1, 1], [], []>} : vector<8x32xbf16>, vector<32x128xbf16>, vector<8x128xf32> -> vector<8x128xf32>
    %c0_36 = arith.constant 0 : index
    %c0_37 = arith.constant 0 : index
    %94 = vector.load %arg13[%c0_36, %c0_37] : memref<1x128xf32, #tpu.memory_space<vmem>>, vector<1x128xf32>
    %95 = vector.broadcast %94 : vector<1x128xf32> to vector<8x128xf32>
    %96 = arith.addf %93, %95 : vector<8x128xf32>
    %cst_38 = arith.constant 5.000000e-01 : f32
    %97 = vector.broadcast %cst_38 : f32 to vector<8x128xf32>
    %98 = arith.mulf %97, %96 : vector<8x128xf32>
    %cst_39 = arith.constant 0.707106769 : f32
    %99 = vector.broadcast %cst_39 : f32 to vector<8x128xf32>
    %100 = arith.mulf %96, %99 : vector<8x128xf32>
    %101 = math.erf %100 : vector<8x128xf32>
    %cst_40 = arith.constant 1.000000e+00 : f32
    %102 = vector.broadcast %cst_40 : f32 to vector<8x128xf32>
    %103 = arith.addf %102, %101 : vector<8x128xf32>
    %104 = arith.mulf %98, %103 : vector<8x128xf32>
    %105 = arith.truncf %104 : vector<8x128xf32> to vector<8x128xbf16>
    %c0_41 = arith.constant 0 : index
    %c0_42 = arith.constant 0 : index
    %106 = vector.load %arg14[%c0_41, %c0_42] : memref<128x32xbf16, #tpu.memory_space<vmem>>, vector<128x32xbf16>
    %cst_43 = arith.constant dense<0.000000e+00> : vector<8x32xf32>
    %107 = tpu.matmul %105, %106, %cst_43 {dimension_numbers = #tpu.dot_dimension_numbers<[1], [0], [0], [1], [0, 0, 1, 1], [], []>} : vector<8x128xbf16>, vector<128x32xbf16>, vector<8x32xf32> -> vector<8x32xf32>
    %c0_44 = arith.constant 0 : index
    %c0_45 = arith.constant 0 : index
    %108 = vector.load %arg15[%c0_44, %c0_45] : memref<1x32xf32, #tpu.memory_space<vmem>>, vector<1x32xf32>
    %109 = vector.broadcast %108 : vector<1x32xf32> to vector<8x32xf32>
    %110 = arith.addf %107, %109 : vector<8x32xf32>
    %111 = arith.addf %90, %110 : vector<8x32xf32>
    %c0_46 = arith.constant 0 : index
    %c0_47 = arith.constant 0 : index
    %112 = vector.load %arg16[%c0_46, %c0_47] : memref<1x32xf32, #tpu.memory_space<vmem>>, vector<1x32xf32>
    %c0_48 = arith.constant 0 : index
    %c0_49 = arith.constant 0 : index
    %113 = vector.load %arg17[%c0_48, %c0_49] : memref<1x32xf32, #tpu.memory_space<vmem>>, vector<1x32xf32>
    %cst_50 = arith.constant dense<0.000000e+00> : vector<8xf32>
    %114 = vector.multi_reduction <add>, %111, %cst_50 [1] : vector<8x32xf32> to vector<8xf32>
    %115 = vector.shape_cast %114 : vector<8xf32> to vector<8x1xf32>
    %cst_51 = arith.constant 3.200000e+01 : f32
    %116 = vector.broadcast %cst_51 : f32 to vector<8x1xf32>
    %117 = arith.divf %115, %116 : vector<8x1xf32>
    %118 = vector.broadcast %117 : vector<8x1xf32> to vector<8x32xf32>
    %119 = arith.subf %111, %118 : vector<8x32xf32>
    %120 = arith.mulf %119, %119 : vector<8x32xf32>
    %cst_52 = arith.constant dense<0.000000e+00> : vector<8xf32>
    %121 = vector.multi_reduction <add>, %120, %cst_52 [1] : vector<8x32xf32> to vector<8xf32>
    %122 = vector.shape_cast %121 : vector<8xf32> to vector<8x1xf32>
    %cst_53 = arith.constant 3.200000e+01 : f32
    %123 = vector.broadcast %cst_53 : f32 to vector<8x1xf32>
    %124 = arith.divf %122, %123 : vector<8x1xf32>
    %125 = vector.broadcast %117 : vector<8x1xf32> to vector<8x32xf32>
    %126 = arith.subf %111, %125 : vector<8x32xf32>
    %cst_54 = arith.constant 9.99999974E-6 : f32
    %127 = vector.broadcast %cst_54 : f32 to vector<8x1xf32>
    %128 = arith.addf %124, %127 : vector<8x1xf32>
    %129 = math.rsqrt %128 : vector<8x1xf32>
    %130 = vector.broadcast %129 : vector<8x1xf32> to vector<8x32xf32>
    %131 = arith.mulf %126, %130 : vector<8x32xf32>
    %132 = vector.broadcast %112 : vector<1x32xf32> to vector<8x32xf32>
    %133 = arith.mulf %131, %132 : vector<8x32xf32>
    %134 = vector.broadcast %113 : vector<1x32xf32> to vector<8x32xf32>
    %135 = arith.addf %133, %134 : vector<8x32xf32>
    %c0_55 = arith.constant 0 : index
    %c0_56 = arith.constant 0 : index
    %c0_57 = arith.constant 0 : index
    %136 = vector.load %arg18[%c0_55, %c0_56, %c0_57] : memref<1x8x32xf32, #tpu.memory_space<vmem>>, vector<1x8x32xf32>
    %137 = vector.shape_cast %136 : vector<1x8x32xf32> to vector<8x32xf32>
    %138 = vector.shape_cast %135 : vector<8x32xf32> to vector<1x8x32xf32>
    tpu.vector_store %arg18[%c0_55, %c0_56, %c0_57], %138 {strides = array<i32>} : memref<1x8x32xf32, #tpu.memory_space<vmem>>, vector<1x8x32xf32>,
    return
  }
  func.func @transform_0(%arg0: i32, %arg1: i32) -> (i32, i32, i32) {
    %c0_i32 = arith.constant 0 : i32
    %c0_i32_0 = arith.constant 0 : i32
    return %arg0, %arg1, %c0_i32 : i32, i32, i32
  }
  func.func @transform_1(%arg0: i32, %arg1: i32) -> (i32, i32, i32) {
    %c0_i32 = arith.constant 0 : i32
    %c0_i32_0 = arith.constant 0 : i32
    %c0_i32_1 = arith.constant 0 : i32
    return %arg0, %c0_i32, %c0_i32_0 : i32, i32, i32
  }
  func.func @transform_2(%arg0: i32, %arg1: i32) -> (i32, i32) {
    %c0_i32 = arith.constant 0 : i32
    %c0_i32_0 = arith.constant 0 : i32
    %c0_i32_1 = arith.constant 0 : i32
    return %c0_i32, %c0_i32_0 : i32, i32
  }
  func.func @transform_3(%arg0: i32, %arg1: i32) -> (i32, i32) {
    %c0_i32 = arith.constant 0 : i32
    %c0_i32_0 = arith.constant 0 : i32
    %c0_i32_1 = arith.constant 0 : i32
    return %c0_i32, %c0_i32_0 : i32, i32
  }
  func.func @transform_4(%arg0: i32, %arg1: i32) -> (i32, i32) {
    %c0_i32 = arith.constant 0 : i32
    %c0_i32_0 = arith.constant 0 : i32
    %c0_i32_1 = arith.constant 0 : i32
    return %c0_i32, %c0_i32_0 : i32, i32
  }
  func.func @transform_5(%arg0: i32, %arg1: i32) -> (i32, i32) {
    %c0_i32 = arith.constant 0 : i32
    %c0_i32_0 = arith.constant 0 : i32
    %c0_i32_1 = arith.constant 0 : i32
    return %c0_i32, %c0_i32_0 : i32, i32
  }
  func.func @transform_6(%arg0: i32, %arg1: i32) -> (i32, i32) {
    %c0_i32 = arith.constant 0 : i32
    %c0_i32_0 = arith.constant 0 : i32
    %c0_i32_1 = arith.constant 0 : i32
    return %c0_i32, %c0_i32_0 : i32, i32
  }
  func.func @transform_7(%arg0: i32, %arg1: i32) -> (i32, i32) {
    %c0_i32 = arith.constant 0 : i32
    %c0_i32_0 = arith.constant 0 : i32
    %c0_i32_1 = arith.constant 0 : i32
    return %c0_i32, %c0_i32_0 : i32, i32
  }
  func.func @transform_8(%arg0: i32, %arg1: i32) -> (i32, i32) {
    %c0_i32 = arith.constant 0 : i32
    %c0_i32_0 = arith.constant 0 : i32
    %c0_i32_1 = arith.constant 0 : i32
    return %c0_i32, %c0_i32_0 : i32, i32
  }
  func.func @transform_9(%arg0: i32, %arg1: i32) -> (i32, i32) {
    %c0_i32 = arith.constant 0 : i32
    %c0_i32_0 = arith.constant 0 : i32
    %c0_i32_1 = arith.constant 0 : i32
    return %c0_i32, %c0_i32_0 : i32, i32
  }
  func.func @transform_10(%arg0: i32, %arg1: i32) -> (i32, i32) {
    %c0_i32 = arith.constant 0 : i32
    %c0_i32_0 = arith.constant 0 : i32
    %c0_i32_1 = arith.constant 0 : i32
    return %c0_i32, %c0_i32_0 : i32, i32
  }
  func.func @transform_11(%arg0: i32, %arg1: i32) -> (i32, i32) {
    %c0_i32 = arith.constant 0 : i32
    %c0_i32_0 = arith.constant 0 : i32
    %c0_i32_1 = arith.constant 0 : i32
    return %c0_i32, %c0_i32_0 : i32, i32
  }
  func.func @transform_12(%arg0: i32, %arg1: i32) -> (i32, i32) {
    %c0_i32 = arith.constant 0 : i32
    %c0_i32_0 = arith.constant 0 : i32
    %c0_i32_1 = arith.constant 0 : i32
    return %c0_i32, %c0_i32_0 : i32, i32
  }
  func.func @transform_13(%arg0: i32, %arg1: i32) -> (i32, i32) {
    %c0_i32 = arith.constant 0 : i32
    %c0_i32_0 = arith.constant 0 : i32
    %c0_i32_1 = arith.constant 0 : i32
    return %c0_i32, %c0_i32_0 : i32, i32
  }
  func.func @transform_14(%arg0: i32, %arg1: i32) -> (i32, i32) {
    %c0_i32 = arith.constant 0 : i32
    %c0_i32_0 = arith.constant 0 : i32
    %c0_i32_1 = arith.constant 0 : i32
    return %c0_i32, %c0_i32_0 : i32, i32
  }
  func.func @transform_15(%arg0: i32, %arg1: i32) -> (i32, i32) {
    %c0_i32 = arith.constant 0 : i32
    %c0_i32_0 = arith.constant 0 : i32
    %c0_i32_1 = arith.constant 0 : i32
    return %c0_i32, %c0_i32_0 : i32, i32
  }
  func.func @transform_16(%arg0: i32, %arg1: i32) -> (i32, i32, i32) {
    %c0_i32 = arith.constant 0 : i32
    %c0_i32_0 = arith.constant 0 : i32
    return %arg0, %arg1, %c0_i32 : i32, i32, i32
  }
}

</mosaic_0001>

<bundles_post_ra>
// kernel: tpu_custom_call.1
= control target key start
LH: loop header
LB: loop body
LE: loop exit
PB: predicated region body
PF: predicated region fallthrough
CT: control target
= control target key end

     0   :  { %s2770_s0 = inlined_call_operand.vmem [shape: f32[2,8,32], index: 0, kind: input, shape index: {}]   ;;  %s2771_s1 = inlined_call_operand.vmem [shape: f32[2,8,32], index: 1, kind: input, shape index: {}]   ;;  %s2772_s2 = inlined_call_operand.vmem [shape: bf16[32,32], index: 2, kind: input, shape index: {}]   ;;  %s2773_s3 = inlined_call_operand.hbm [shape: f32[1,32], index: 3, kind: input, shape index: {}]   ;;  %s2774_s4 = inlined_call_operand.vmem [shape: bf16[32,64], index: 4, kind: input, shape index: {}]   ;;  %s2775_s5 = inlined_call_operand.hbm [shape: f32[1,64], index: 5, kind: input, shape index: {}]   ;;  %s2776_s6 = inlined_call_operand.vmem [shape: bf16[32,32], index: 6, kind: input, shape index: {}]   ;;  %s2777_s7 = inlined_call_operand.hbm [shape: f32[1,32], index: 7, kind: input, shape index: {}]   ;;  %s2778_s8 = inlined_call_operand.hbm [shape: f32[1,32], index: 8, kind: input, shape index: {}]   ;;  %s2779_s9 = inlined_call_operand.hbm [shape: f32[1,32], index: 9, kind: input, shape index: {}]   ;;  %s2780_s10 = inlined_call_operand.vmem [shape: bf16[32,128], index: 10, kind: input, shape index: {}]   ;;  %s2781_s11 = inlined_call_operand.vmem [shape: f32[1,128], index: 11, kind: input, shape index: {}]   ;;  %s2782_s12 = inlined_call_operand.vmem [shape: bf16[128,32], index: 12, kind: input, shape index: {}]   ;;  %s2783_s13 = inlined_call_operand.vmem [shape: f32[1,32], index: 13, kind: input, shape index: {}]   ;;  %s2784_s14 = inlined_call_operand.vmem [shape: f32[1,32], index: 14, kind: input, shape index: {}]   ;;  %s2785_s15 = inlined_call_operand.vmem [shape: f32[1,32], index: 15, kind: input, shape index: {}]   ;;  %s2786_s16 = inlined_call_operand.hbm [shape: f32[2,8,32], index: 16, kind: output, shape index: {}]  }
   0x1   :  { %2799 = sst [smem:[#allocation25_spill]] %s2770_s0 }
   0x2   :  { %2800 = sst [smem:[#allocation26_spill]] %s2771_s1 }
   0x3   :  { %2801 = sst [smem:[#allocation27_spill]] %s2775_s5 }
   0x4   :  { %2802 = sst [smem:[#allocation28_spill]] %s2786_s16 }
   0x5   :  { %21 = vsyncpa [#allocation5], 0 }
   0x6   :  { %22 = vsyncpa [#allocation8], 0 }
   0x7   :  { %23 = vsyncpa [#allocation11], 0 }
   0x8   :  { %24 = vsyncpa [#allocation6], 0 }
   0x9   :  { %26 = vsyncpa [#allocation6 + $0x1], 0  ;;  %s2426_s21 = smov 0   ;;  %s2428_s22 = smov 0  }
   0xa   :  { %s2430_s23 = smov 0   ;;  %s2432_s24 = smov 0  }
   0xb   :  { %s2434_s25 = smov 0   ;;  %s2436_s26 = smov 0  }
   0xc LB: > { %2803 = sst [smem:[#allocation18_spill]] %s2301_s21  ;;  %s1749_s27 = sadd.s32 4294967295, %s2321_s26   ;;  %s2321_s26 = sphi %s2436_s26, %s32_s26   ;;  %s2317_s25 = sphi %s2434_s25, %s2831_s25   ;;  %s2313_s24 = sphi %s2432_s24, %s2834_s24   ;;  %s2309_s23 = sphi %s2430_s23, %s2829_s23   ;;  %s2305_s22 = sphi %s2428_s22, %s2833_s22   ;;  %s2301_s21 = sphi %s2426_s21, %s2832_s21  }
   0xd   : > { %2804 = sst [smem:[#allocation19_spill]] %s2309_s23  ;;  %s1750_s28 = sadd.s32 4294967294, %s2321_s26  }
   0xe   : > { %2805 = sst [smem:[#allocation20_spill]] %s2317_s25  ;;  %s44_s29 = sadd.s32 1, %s2317_s25 }
   0xf   : > { %2806 = sst [smem:[#allocation21_spill]] %s2321_s26  ;;  %s401_s30 = sadd.s32 1, %s2309_s23 }
  0x10   : > { %p46_p0 = scmp.ge.s32.totalorder %s44_s29, 2  ;;  %p411_p1 = scmp.ne.s32.totalorder %s2309_s23, %s2305_s22 }
  0x11   : > { %p412_p2 = scmp.eq.s32.totalorder %s1749_s27, 1  ;;  %p417_p3 = scmp.ne.s32.totalorder %s2305_s22, %s2301_s21 }
  0x12   : > { %s2836_s29 = smov (%p46_p0, %s44_s29), 0  ;;  %p418_p5 = scmp.eq.s32.totalorder %s1750_s28, 1 }
  0x13   : > { %2807 = sst [smem:[#allocation22_spill]] %s2836_s29  ;;  %p2466_p4 = por %p412_p2, %p411_p1 }
  0x14   : > { %s396_s17 = ssub.s32 %s2317_s25, %s2836_s29  ;;  %p1751_p6 = scmp.ge.s32.totalorder %s2321_s26, 1 }
  0x15   : > { %s2808_s0 = scalar_select %p2466_p4, 1, 0 }
  0x16   : > { %p399_p7 = scmp.eq.s32.totalorder %s396_s17, 0  ;;  %p2473_p8 = por %p418_p5, %p417_p3 }
  0x17   : > { %p425_p9 = scmp.lt.s32.totalorder %s2321_s26, 3  ;;  %p2485_p11 = scmp.eq.s32.totalorder %s1749_s27, 0 }
  0x18   : > { %s2809_s18 = scalar_select %p2473_p8, 1, 0 }
  0x19   : > { %s2479_s19 = scalar_select %p399_p7, %s2309_s23, %s401_s30  }
  0x1a   : > { %2810 = sst [smem:[#allocation23_spill]] %s2809_s18  ;;  %p2481_p10 = pnand %p1751_p6, %p425_p9 }
  0x1b   : > { %2811 = sst [smem:[#allocation24_spill]] %s2479_s19  ;;  %s2323_s28 = smov [#allocation7]  }
  0x1c   : > { %s2812_s20 = scalar_select %p2481_p10, 1, 0 }
  0x1d   : > { %s2813_s21 = scalar_select %p2485_p11, 1, 0 }
  0x1e   : > { %p1969_p12 = pneg %p2481_p10  ;;  %s455_s17 = sshll.u32 %s2323_s28, 4  ;;  %s456_s17 = int_to_ptr.vmem [resolvable:$true] %s455_s17 }
  0x1f   : > { %s2324_s29 = smov [#allocation10]   ;;  %s2114_s19 = scalar_lea.vmem %s456_s17, 16 }
  0x20   : > { %s480_s25 = sshll.u32 %s2324_s29, 4  ;;  %p2493_p13 = pnand %p2485_p11, %p1969_p12  ;;  %s481_s25 = int_to_ptr.vmem [resolvable:$true] %s480_s25 }
  0x21   : > { %p2115_p1 = scmp.ne.s32.totalorder %s456_s17, %s2114_s19  ;;  %s2121_s28 = scalar_lea.vmem %s456_s17, 32 }
  0x22   : > { %p2499_p0 = pneg %p2493_p13  ;;  %p2122_p5 = scmp.lt.s32.totalorder %s456_s17, %s456_s17 }
  0x23   : > { %p2123_p6 = scmp.lt.s32.totalorder %s2121_s28, %s2114_s19 }
  0x24   : > { %p2117_p2 = pnand %p2115_p1, %p2499_p0 }
  0x25   : > { %p2124_p7 = por %p2123_p6, %p2122_p5 }
  0x26   : > { %p2118_p3 = pneg %p2117_p2 }
  0x28   : > { %p2125_p9 = pnand %p2124_p7, %p2118_p3 }
  0x2a   : > { %2128 = shalt.err (!%p2125_p9)
}
  0x2b   : > { %s2816_s5 = sld [smem:[#allocation27_spill]]  ;;  %s2140_s18 = scalar_lea.vmem %s481_s25, 16 }
  0x2c   : > { %p2141_p12 = scmp.ne.s32.totalorder %s481_s25, %s2140_s18  ;;  %s2147_s26 = scalar_lea.vmem %s481_s25, 32 }
  0x2d   : > { %p2148_p1 = scmp.lt.s32.totalorder %s481_s25, %s481_s25  ;;  %p2149_p2 = scmp.lt.s32.totalorder %s2147_s26, %s2140_s18 }
  0x2e   : > { %p2143_p8 = pnand %p2141_p12, %p2499_p0 }
  0x2f   : > { %p2150_p11 = por %p2149_p2, %p2148_p1 }
  0x30   : > { %p2144_p4 = pneg %p2143_p8 }
  0x31   : > { %1975 = dma.hbm_to_vmem [thread:$0]  (!%p2493_p13), %s2816_s5, 16, %s456_s17, [#allocation8]  }
  0x32   : > { %p2151_p10 = pnand %p2150_p11, %p2144_p4 }
  0x34   : > { %2154 = shalt.err (!%p2151_p10)
}
  0x35   : > { %1981 = dma.hbm_to_vmem [thread:$0]  (!%p2493_p13), %s2778_s8, 16, %s481_s25, [#allocation11]  }
  0x36   : > { %s2325_s23 = smov [#allocation4]   ;;  %s2326_s29 = smov [#allocation9]  }
  0x37   : > { %s441_s17 = sshll.u32 %s2325_s23, 4  ;;  %s469_s5 = sshll.u32 %s2326_s29, 4  ;;  %s442_s17 = int_to_ptr.vmem [resolvable:$true] %s441_s17  ;;  %s470_s5 = int_to_ptr.vmem [resolvable:$true] %s469_s5 }
  0x38   : > { %s2166_s16 = scalar_lea.vmem %s442_s17, 16  ;;  %s2173_s26 = scalar_lea.vmem %s442_s17, 32 }
  0x39   : > { %p2167_p8 = scmp.ne.s32.totalorder %s442_s17, %s2166_s16  ;;  %p2174_p4 = scmp.lt.s32.totalorder %s442_s17, %s442_s17 }
  0x3a   : > { %p2175_p10 = scmp.lt.s32.totalorder %s2173_s26, %s2166_s16 }
  0x3b   : > { %p2169_p3 = pnand %p2167_p8, %p2499_p0 }
  0x3c   : > { %p2176_p11 = por %p2175_p10, %p2174_p4 }
  0x3d   : > { %p2170_p5 = pneg %p2169_p3 }
  0x3f   : > { %p2177_p6 = pnand %p2176_p11, %p2170_p5 }
  0x41   : > { %2180 = shalt.err (!%p2177_p6)
}
  0x42   : > { %1972 = dma.hbm_to_vmem [thread:$0]  (!%p2493_p13), %s2773_s3, 16, %s442_s17, [#allocation5]  }
  0x43   : > { %s2192_s19 = scalar_lea.vmem %s470_s5, 16  ;;  %s2199_s28 = scalar_lea.vmem %s470_s5, 32 }
  0x44   : > { %p2193_p7 = scmp.ne.s32.totalorder %s470_s5, %s2192_s19  ;;  %p2200_p1 = scmp.lt.s32.totalorder %s470_s5, %s470_s5 }
  0x45   : > { %p2201_p2 = scmp.lt.s32.totalorder %s2199_s28, %s2192_s19 }
  0x46   : > { %p2195_p9 = pnand %p2193_p7, %p2499_p0 }
  0x47   : > { %p2202_p8 = por %p2201_p2, %p2200_p1 }
  0x48   : > { %p2196_p12 = pneg %p2195_p9 }
  0x4a   : > { %p2203_p3 = pnand %p2202_p8, %p2196_p12 }
  0x4c   : > { %2206 = shalt.err (!%p2203_p3)
}
  0x4d   : > { %1978 = dma.hbm_to_vmem [thread:$0]  (!%p2493_p13), %s2777_s7, 16, %s470_s5, [#allocation8]  }
  0x4e   : > { %s2327_s17 = smov [#allocation12]  }
  0x4f   : > { %s491_s29 = sshll.u32 %s2327_s17, 4  ;;  %s492_s29 = int_to_ptr.vmem [resolvable:$true] %s491_s29 }
  0x50   : > { %s2218_s26 = scalar_lea.vmem %s492_s29, 16  ;;  %s2225_s18 = scalar_lea.vmem %s492_s29, 32 }
  0x51   : > { %p2219_p5 = scmp.ne.s32.totalorder %s492_s29, %s2218_s26  ;;  %p2226_p11 = scmp.lt.s32.totalorder %s492_s29, %s492_s29 }
  0x52   : > { %p2227_p6 = scmp.lt.s32.totalorder %s2225_s18, %s2218_s26 }
  0x53   : > { %p2221_p4 = pnand %p2219_p5, %p2499_p0 }
  0x54   : > { %p2228_p7 = por %p2227_p6, %p2226_p11 }
  0x55   : > { %p2222_p10 = pneg %p2221_p4 }
  0x57   : > { %p2229_p9 = pnand %p2228_p7, %p2222_p10 }
  0x59   : > { %2232 = shalt.err (!%p2229_p9)
}
  0x5a   : > { %1984 = dma.hbm_to_vmem [thread:$0]  (!%p2493_p13), %s2779_s9, 16, %s492_s29, [#allocation11]  }
  0x5b   : > { %p2817_p12 = scmp.ne.s32.totalorder %s2812_s20, 0 }
  0x5c   : > { %p2818_p1 = scmp.ne.s32.totalorder (!%p2817_p12), %s2813_s21, 0 }
  0x5d   : > { %539 = sbr.rel (%p2817_p12) target bundleno = 2516 (0x9d4), region = 84 }
  0x62   : > { %2284 = dma.done.wait (%p2818_p1), [#allocation5], 16  }
  0x63   : > { %2286 = vsyncadd (%p2818_p1), [#allocation5], 4294967280 }
  0x64   : > { %2288 = dma.done.wait (%p2818_p1), [#allocation8], 32  }
  0x65   : > { %2290 = vsyncadd (%p2818_p1), [#allocation8], 4294967264 }
  0x66   : > { %2292 = dma.done.wait (%p2818_p1), [#allocation11], 32  }
  0x67   : > { %2294 = vsyncadd (%p2818_p1), [#allocation11], 4294967264  ;;  %p611_p13 = scmp.lt.s32.totalorder %s2313_s24, 1  ;;  %v2328_v0 = vmov 0.0   ;;  %vm2329_vm0 = vmmov 0   ;;  %s2819_s1 = sld [smem:[#allocation26_spill]]  ;;  %v1013_v40 = vlaneseq }
  0x68   : > { %1847 = vmatprep.subr.bf16.mxu1 %v2328_v0  ;;  %1851 = vmatprep.mubr.msk.bf16.mxu1 %vm2329_vm0, %v2328_v0  ;;  %v2065_v1 = vld [vmem:[%s2774_s4 + $0x8] sm:$0xff]   ;;  %v2066_v2 = vld [vmem:[%s2774_s4] sm:$0xff]   ;;  %vm652_vm1 = vcmask 261120   ;;  %s2820_s19 = sld [smem:[#allocation25_spill]]  ;;  %vm697_vm2 = vcmask 60416   ;;  %s2332_s28 = smov 112  }
  0x69   : > { %s612_s5 = scalar_select %p611_p13, %s2313_s24, 1  ;;  %1875 = vmatprep.subr.bf16.mxu0 %v2328_v0  ;;  %1877 = vmatprep.mubr.msk.bf16.mxu0 %vm2329_vm0, %v2328_v0  ;;  %v2067_v4 = vld [vmem:[%s2772_s2 + $0x8] sm:$0xff]   ;;  %v2068_v7 = vld [vmem:[%s2772_s2] sm:$0xff]   ;;  %vm827_vm3 = vcmask 64512   ;;  %v1014_v41 = vshrl.u32 %v1013_v40, 7  ;;  %v1018_v42 = vand.u32 127, %v1013_v40 }
  0x6a   : > { %1848 = vmatpush3.bf16.msra.mxu1 %v2065_v1  ;;  %v1767_v9 = vld [vmem:[#allocation7] ss:$0 sm:$0xff]  ;;  %v1772_v16 = vld [vmem:[#allocation4] ss:$0 sm:$0xff]  ;;  %s2333_s16 = smov 96   ;;  %vm1089_vm5 = vcmask 1043456  }
  0x6b   : > { %s1765_s20 = sshll.u32 %s612_s5, 3  ;;  %1849 = vmatprep.subr.bf16.mxu1 %v2328_v0  ;;  %vm1019_vm4 = vcmp.ge.s32.totalorder %v1014_v41, %v1018_v42  ;;  %s2334_s23 = smov 80   ;;  %vm1284_vm6 = vcmask 130048   ;;  %vm1286_vm7 = vcmask 195584  }
  0x6c   : > { %s2335_s17 = smov 72   ;;  %s2336_s29 = smov 88  }
  0x6d   : > { %s621_s27 = scalar_lea.vmem %s2819_s1, %s1765_s20  ;;  %s2338_s30 = smov 16  }
  0x6e   : > { %v627_v3 = vld [vmem:[%s621_s27] sm:$0xff]  ;;  %s617_s5 = scalar_lea.vmem %s2820_s19, %s1765_s20  ;;  %1850 = vmatpush3.bf16.msra.mxu1 %v2066_v2  ;;  %s2330_s20 = smov 104  }
  0x6f   : > { %v628_v5 = vpack.c.bf16 %v627_v3, %v627_v3  ;;  %1855 = vmatprep.subr.bf16.mxu1 %v2328_v0  ;;  %v2577_v6 = vld [vmem:[%s617_s5] sm:$0xff]  ;;  %s2331_s27 = smov 120   ;;  %s2337_s5 = smov 8  }
  0x70   : > { %v737_v8 = vpack.c.bf16 %v2577_v6, %v2577_v6  ;;  %s2339_s21 = smov 24   ;;  %s608_s19 = sand.u32 1, %s2305_s22  }
  0x71   : > { %1852 = vmatmul.mubr.msk.bf16.vlgmr.msra.gmra.mxu1 %vm652_vm1, %v628_v5  ;;  %s2821_s26 = sld [smem:[#allocation28_spill]]  ;;  %s1602_s1 = scalar_lea.sflag [#allocation6], %s608_s19 }
  0x72   : > { %1856 = vmatpush3.bf16.msra.mxu1 %v2067_v4  ;;  %1859 = vmatprep.mubr.msk.bf16.mxu1 %vm2329_vm0, %v2328_v0  ;;  %p2823_p2 = scmp.ne.s32.totalorder %s2808_s0, 0 }
  0x73   : > { %1857 = vmatprep.subr.bf16.mxu1 %v2328_v0 }
  0x76   : > { %1858 = vmatpush3.bf16.msra.mxu1 %v2068_v7 }
  0x77   : > { %1863 = vmatprep.subr.bf16.mxu1 %v2328_v0  ;;  %s2822_s18 = smov %s2821_s26 }
  0x79   : > { %1860 = vmatmul.mubr.msk.bf16.vlgmr.msra.gmra.mxu1 %vm652_vm1, %v737_v8 }
  0x7a   : > { %1865 = vmatprep.mubr.msk.bf16.mxu1 %vm2329_vm0, %v2328_v0 }
 0x131   : > { %v690_v10 = vpop.f32.mrf.mxu1 }
 0x132   : > { %v691_v11 = vadd.f32 %v1767_v9, %v690_v10 }
 0x133   : > { %v1853_v12 = vpop.f32.mrf.mxu1 }
 0x134   : > { %v2592_v13 = vpack.c.bf16 %v691_v11, %v691_v11 }
 0x135   : > { %v693_v14 = vpop.f32.mrf.mxu1 }
 0x136   : > { %698 = vst.msk [vmem:[#allocation2] sm:$0xf] %vm697_vm2, %v2592_v13  ;;  %726 = vrot.lane.b32.xlu1 %v2592_v13, %s2330_s20  ;;  %706 = vrot.lane.b32.xlu0 %v2592_v13, %s2331_s27 }
 0x137   : > { %v1854_v15 = vpop.f32.mrf.mxu1 }
 0x139   : > { %v799_v17 = vpop.f32.mrf.mxu1 }
 0x13a   : > { %716 = vrot.lane.b32.xlu0 %v2592_v13, %s2332_s28  ;;  %v800_v18 = vadd.f32 %v1772_v16, %v799_v17 }
 0x13b   : > { %v1861_v19 = vpop.f32.mrf.mxu1 }
 0x13c   : > { %806 = vrot.lane.b32.xlu1 %v800_v18, %s2331_s27  ;;  %v815_v24 = vpack.c.bf16 %v800_v18, %v800_v18 }
 0x13d   : > { %v802_v20 = vpop.f32.mrf.mxu1  ;;  %v819_v21 = vld [vmem:[#allocation2] sm:$0xf] }
 0x13e   : > { %v832_v22 = vsel %vm827_vm3, %v819_v21, 0  ;;  %809 = vrot.lane.b32.xlu0 %v800_v18, %s2332_s28  ;;  %s1806_s28 = sshll.u32 %s2313_s24, 7 }
 0x13f   : > { %1864 = vmatpush3.bf16.xpose.msra.mxu1 %v832_v22  ;;  %v1862_v23 = vpop.f32.mrf.mxu1  ;;  %s1614_s25 = scalar_lea.hbm %s2821_s26, %s1806_s28 }
 0x140   : > { %812 = vrot.lane.b32.xlu1 %v800_v18, %s2330_s20  ;;  %1869 = vmatprep.subr.bf16.mxu1 %v2328_v0 }
 0x146   : > { %1866 = vmatmul.mubr.msk.bf16.vlgmr.msra.gmra.mxu1 %vm827_vm3, %v815_v24 }
 0x147   : > { %1871 = vmatprep.mubr.msk.bf16.mxu1 %vm2329_vm0, %v2328_v0 }
 0x1a8   : > { %v727_v25 = vpop.permute.xlu1 %726  ;;  %v707_v26 = vpop.permute.xlu0 %706 }
 0x1a9   : > { %730 = vst.msk [vmem:[#allocation2 + $0xc] sm:$0xf] %vm697_vm2, %v727_v25  ;;  %710 = vst.msk [vmem:[#allocation2 + $0x4] sm:$0xf] %vm697_vm2, %v707_v26 }
 0x1ac   : > { %v717_v27 = vpop.permute.xlu0 %716 }
 0x1ad   : > { %720 = vst.msk [vmem:[#allocation2 + $0x8] sm:$0xf] %vm697_vm2, %v717_v27 }
 0x1ae   : > { %v807_v30 = vpop.permute.xlu1 %806 }
 0x1af   : > { %v816_v32 = vpack.c.bf16 %v807_v30, %v807_v30 }
 0x1b0   : > { %v820_v28 = vld [vmem:[#allocation2 + $0x4] sm:$0xf]  ;;  %v822_v34 = vld [vmem:[#allocation2 + $0xc] sm:$0xf]  ;;  %v810_v35 = vpop.permute.xlu0 %809 }
 0x1b1   : > { %v878_v29 = vsel %vm827_vm3, %v820_v28, 0  ;;  %v970_v36 = vsel %vm827_vm3, %v822_v34, 0  ;;  %v817_v37 = vpack.c.bf16 %v810_v35, %v810_v35 }
 0x1b2   : > { %1870 = vmatpush3.bf16.xpose.msra.mxu1 %v878_v29  ;;  %v813_v38 = vpop.permute.xlu1 %812 }
 0x1b3   : > { %1881 = vmatprep.subr.bf16.mxu1 %v2328_v0  ;;  %v818_v39 = vpack.c.bf16 %v813_v38, %v813_v38 }
 0x1b4   : > { %v821_v31 = vld [vmem:[#allocation2 + $0x8] sm:$0xf] }
 0x1b5   : > { %v924_v33 = vsel %vm827_vm3, %v821_v31, 0 }
 0x1b6   : > { %1876 = vmatpush3.bf16.xpose.msra.mxu0 %v924_v33 }
 0x1b7   : > { %1887 = vmatprep.subr.bf16.mxu0 %v2328_v0 }
 0x1b9   : > { %1872 = vmatmul.mubr.msk.bf16.vlgmr.msra.gmra.mxu1 %vm827_vm3, %v816_v32 }
 0x1ba   : > { %1882 = vmatpush3.bf16.xpose.msra.mxu1 %v970_v36  ;;  %1883 = vmatprep.mubr.msk.bf16.mxu1 %vm2329_vm0, %v2328_v0 }
 0x1bb   : > { %1893 = vmatprep.subr.bf16.mxu1 %v2328_v0 }
 0x1bd   : > { %1878 = vmatmul.mubr.msk.bf16.vlgmr.msra.gmra.mxu0 %vm827_vm3, %v817_v37 }
 0x1be   : > { %1889 = vmatprep.mubr.msk.bf16.mxu0 %vm2329_vm0, %v2328_v0 }
 0x1c1   : > { %1884 = vmatmul.mubr.msk.bf16.vlgmr.msra.gmra.mxu1 %vm827_vm3, %v818_v39 }
 0x1c2   : > { %1895 = vmatprep.mubr.msk.bf16.mxu1 %vm2329_vm0, %v2328_v0 }
 0x206   : > { %v868_v43 = vpop.f32.mrf.mxu1 }
 0x207   : > { %v1022_v44 = vsel %vm1019_vm4, %v868_v43, -1e+30 }
 0x208   : > { %v1867_v45 = vpop.f32.mrf.mxu1  ;;  %v1026_v46 = vsel %vm827_vm3, %v1022_v44, -inf }
 0x209   : > { %1027 = vmax.xlane.f32.xlu0 %v1026_v46 }
 0x20a   : > { %v871_v47 = vpop.f32.mrf.mxu1 }
 0x20c   : > { %v1868_v48 = vpop.f32.mrf.mxu1 }
 0x279   : > { %v914_v49 = vpop.f32.mrf.mxu1 }
 0x27a   : > { %v1023_v50 = vsel %vm1019_vm4, %v914_v49, -1e+30 }
 0x27b   : > { %v1873_v51 = vpop.f32.mrf.mxu1  ;;  %v1029_v52 = vsel %vm827_vm3, %v1023_v50, -inf }
 0x27c   : > { %1030 = vmax.xlane.f32.xlu1 %v1029_v52 }
 0x27d   : > { %v917_v53 = vpop.f32.mrf.mxu1  ;;  %v960_v54 = vpop.f32.mrf.mxu0 }
 0x27e   : > { %v1024_v55 = vsel %vm1019_vm4, %v960_v54, -1e+30 }
 0x27f   : > { %v1874_v56 = vpop.f32.mrf.mxu1  ;;  %v1879_v57 = vpop.f32.mrf.mxu0  ;;  %v1032_v58 = vsel %vm827_vm3, %v1024_v55, -inf }
 0x280   : > { %1033 = vmax.xlane.f32.xlu0 %v1032_v58 }
 0x281   : > { %v963_v59 = vpop.f32.mrf.mxu0  ;;  %v1006_v60 = vpop.f32.mrf.mxu1 }
 0x282   : > { %v1025_v61 = vsel %vm1019_vm4, %v1006_v60, -1e+30 }
 0x283   : > { %v1880_v62 = vpop.f32.mrf.mxu0  ;;  %v1885_v63 = vpop.f32.mrf.mxu1  ;;  %v1035_v1 = vsel %vm827_vm3, %v1025_v61, -inf }
 0x284   : > { %1036 = vmax.xlane.f32.xlu0 %v1035_v1 }
 0x285   : > { %v1009_v2 = vpop.f32.mrf.mxu1 }
 0x287   : > { %v1886_v3 = vpop.f32.mrf.mxu1 }
 0x28d   : > { %702 = vrot.lane.b32.xlu1 %v2592_v13, %s2333_s16 }
 0x292   : > { %v1028_v4 = vpop.xlane.xlu0 %1027 }
 0x293   : > { %v1038_v5 = vsub.f32 %v1022_v44, %v1028_v4 }
 0x295   : > { %v1042_v7 = vmul.f32 1.442695, %v1038_v5 }
 0x297   : > { %2081 = vpow2.f32 %v1042_v7  ;;  %v2069_v7 = vld [vmem:[%s2776_s6 + $0x8] sm:$0xff]  }
 0x2a4   : > { %v2082_v8 = vpop.eup %2081 }
 0x2a5   : > { %v1050_v9 = vsel %vm827_vm3, %v2082_v8, 0.0 }
 0x2b1   : > { %1051 = vadd.xlane.f32.xlu1 %v1050_v9 }
 0x305   : > { %v1031_v10 = vpop.xlane.xlu1 %1030 }
 0x306   : > { %v1039_v11 = vsub.f32 %v1023_v50, %v1031_v10 }
 0x308   : > { %v1044_v12 = vmul.f32 1.442695, %v1039_v11 }
 0x309   : > { %v1034_v14 = vpop.xlane.xlu0 %1033  ;;  %v703_v15 = vpop.permute.xlu1 %702 }
 0x30a   : > { %2083 = vpow2.f32 %v1044_v12  ;;  %v1040_v16 = vsub.f32 %v1024_v55, %v1034_v14  ;;  %705 = vst.msk [vmem:[#allocation3] sm:$0xf] %vm697_vm2, %v703_v15 }
 0x30c   : > { %v1046_v17 = vmul.f32 1.442695, %v1040_v16 }
 0x30d   : > { %v1037_v18 = vpop.xlane.xlu0 %1036 }
 0x30e   : > { %2085 = vpow2.f32 %v1046_v17  ;;  %v1041_v19 = vsub.f32 %v1025_v61, %v1037_v18 }
 0x310   : > { %v1048_v20 = vmul.f32 1.442695, %v1041_v19 }
 0x311   : > { %v823_v21 = vld [vmem:[#allocation3] sm:$0xf] }
 0x312   : > { %2087 = vpow2.f32 %v1048_v20  ;;  %v1091_v22 = vsel %vm1089_vm5, %v823_v21, 0 }
 0x313   : > { %1888 = vmatpush3.bf16.msra.mxu0 %v1091_v22 }
 0x314   : > { %1899 = vmatprep.subr.bf16.mxu0 %v2328_v0 }
 0x317   : > { %v2084_v23 = vpop.eup %2083 }
 0x318   : > { %v1053_v24 = vsel %vm827_vm3, %v2084_v23, 0.0 }
 0x319   : > { %1054 = vadd.xlane.f32.xlu0 %v1053_v24 }
 0x31b   : > { %v2086_v25 = vpop.eup %2085 }
 0x31c   : > { %v1056_v26 = vsel %vm827_vm3, %v2086_v25, 0.0 }
 0x31d   : > { %1057 = vadd.xlane.f32.xlu1 %v1056_v26 }
 0x31f   : > { %v2088_v27 = vpop.eup %2087 }
 0x320   : > { %v1059_v28 = vsel %vm827_vm3, %v2088_v27, 0.0 }
 0x321   : > { %1060 = vadd.xlane.f32.xlu0 %v1059_v28 }
 0x32e   : > { %721 = vrot.lane.b32.xlu1 %v2592_v13, %s2334_s23 }
 0x332   : > { %731 = vrot.lane.b32.xlu1 %v2592_v13, %s2335_s17 }
 0x337   : > { %711 = vrot.lane.b32.xlu0 %v2592_v13, %s2336_s29 }
 0x33a   : > { %v1052_v29 = vpop.xlane.xlu1 %1051 }
 0x33b   : > { %2089 = vrcp.f32 %v1052_v29 }
 0x348   : > { %v2090_v30 = vpop.eup %2089 }
 0x349   : > { %v1066_v31 = vmul.f32 %v2090_v30, %v1052_v29  ;;  %v1784_v29 = vld [vmem:[#allocation9] ss:$0 sm:$0xff] }
 0x34b   : > { %v1070_v32 = vsub.f32 2.0, %v1066_v31 }
 0x34d   : > { %v1074_v33 = vmul.f32 %v2090_v30, %v1070_v32 }
 0x34f   : > { %v1078_v34 = vmul.f32 %v2082_v8, %v1074_v33  ;;  %v2070_v8 = vld [vmem:[%s2776_s6] sm:$0xff]  }
 0x351   : > { %v1082_v35 = vpack.c.bf16 %v1078_v34, %v1078_v34 }
 0x353   : > { %1890 = vmatmul.mubr.msk.bf16.vlgmr.msra.gmra.mxu0 %vm827_vm3, %v1082_v35 }
 0x354   : > { %1901 = vmatprep.mubr.msk.bf16.mxu0 %vm2329_vm0, %v2328_v0 }
 0x3a2   : > { %v1055_v36 = vpop.xlane.xlu0 %1054 }
 0x3a3   : > { %2091 = vrcp.f32 %v1055_v36 }
 0x3a6   : > { %v1058_v37 = vpop.xlane.xlu1 %1057 }
 0x3a7   : > { %2093 = vrcp.f32 %v1058_v37 }
 0x3aa   : > { %v722_v38 = vpop.permute.xlu1 %721  ;;  %v1061_v39 = vpop.xlane.xlu0 %1060 }
 0x3ab   : > { %725 = vst.msk [vmem:[#allocation3 + $0x8] sm:$0xf] %vm697_vm2, %v722_v38  ;;  %2095 = vrcp.f32 %v1061_v39 }
 0x3ae   : > { %v732_v13 = vpop.permute.xlu1 %731  ;;  %v712_v40 = vpop.permute.xlu0 %711 }
 0x3af   : > { %735 = vst.msk [vmem:[#allocation3 + $0xc] sm:$0xf] %vm697_vm2, %v732_v13  ;;  %715 = vst.msk [vmem:[#allocation3 + $0x4] sm:$0xf] %vm697_vm2, %v712_v40 }
 0x3b0   : > { %v2092_v41 = vpop.eup %2091 }
 0x3b1   : > { %v1067_v42 = vmul.f32 %v2092_v41, %v1055_v36 }
 0x3b2   : > { %v825_v43 = vld [vmem:[#allocation3 + $0x8] sm:$0xf] }
 0x3b3   : > { %v1071_v44 = vsub.f32 2.0, %v1067_v42  ;;  %v1183_v45 = vsel %vm1089_vm5, %v825_v43, 0  ;;  %v2073_v42 = vld [vmem:[%s2782_s12 + $0x38] sm:$0xff]   ;;  %v2074_v43 = vld [vmem:[%s2782_s12 + $0x30] sm:$0xff]  }
 0x3b4   : > { %v2094_v46 = vpop.eup %2093  ;;  %1900 = vmatpush3.bf16.msra.mxu0 %v1183_v45 }
 0x3b5   : > { %v1075_v47 = vmul.f32 %v2092_v41, %v1071_v44  ;;  %v1068_v48 = vmul.f32 %v2094_v46, %v1058_v37  ;;  %1911 = vmatprep.subr.bf16.mxu0 %v2328_v0  ;;  %v2071_v41 = vld [vmem:[%s2780_s10 + $0x8] sm:$0xff]  }
 0x3b6   : > { %v824_v49 = vld [vmem:[#allocation3 + $0x4] sm:$0xf]  ;;  %v826_v54 = vld [vmem:[#allocation3 + $0xc] sm:$0xf] }
 0x3b7   : > { %v1079_v50 = vmul.f32 %v2084_v23, %v1075_v47  ;;  %v1072_v51 = vsub.f32 2.0, %v1068_v48  ;;  %v1137_v52 = vsel %vm1089_vm5, %v824_v49, 0  ;;  %v1229_v60 = vsel %vm1089_vm5, %v826_v54, 0  ;;  %v1788_v48 = vld [vmem:[#allocation10] ss:$0 sm:$0xff]  ;;  %v2075_v54 = vld [vmem:[%s2782_s12 + $0x28] sm:$0xff]  }
 0x3b8   : > { %v2096_v53 = vpop.eup %2095  ;;  %1894 = vmatpush3.bf16.msra.mxu1 %v1137_v52 }
 0x3b9   : > { %v1083_v55 = vpack.c.bf16 %v1079_v50, %v1079_v50  ;;  %v1076_v56 = vmul.f32 %v2094_v46, %v1072_v51  ;;  %v1069_v57 = vmul.f32 %v2096_v53, %v1061_v39  ;;  %1905 = vmatprep.subr.bf16.mxu1 %v2328_v0  ;;  %v1789_v50 = vld [vmem:[#allocation12] ss:$0 sm:$0xff] }
 0x3bb   : > { %v1080_v58 = vmul.f32 %v2086_v25, %v1076_v56  ;;  %v1073_v59 = vsub.f32 2.0, %v1069_v57  ;;  %1896 = vmatmul.mubr.msk.bf16.vlgmr.msra.gmra.mxu1 %vm827_vm3, %v1083_v55  ;;  %v2076_v55 = vld [vmem:[%s2782_s12 + $0x20] sm:$0xff]   ;;  %v2077_v56 = vld [vmem:[%s2782_s12 + $0x18] sm:$0xff]   ;;  %v2078_v57 = vld [vmem:[%s2782_s12 + $0x10] sm:$0xff]  }
 0x3bc   : > { %1906 = vmatpush3.bf16.msra.mxu1 %v1229_v60  ;;  %1907 = vmatprep.mubr.msk.bf16.mxu1 %vm2329_vm0, %v2328_v0  ;;  %v1790_v60 = vld [vmem:[%s2781_s11] ss:$0 sm:$0xff] }
 0x3bd   : > { %v1084_v61 = vpack.c.bf16 %v1080_v58, %v1080_v58  ;;  %v1077_v62 = vmul.f32 %v2096_v53, %v1073_v59  ;;  %1919 = vmatprep.subr.bf16.mxu1 %v2328_v0  ;;  %v2079_v58 = vld [vmem:[%s2782_s12 + $0x8] sm:$0xff]   ;;  %v2080_v59 = vld [vmem:[%s2782_s12] sm:$0xff]  }
 0x3bf   : > { %v1081_v63 = vmul.f32 %v2088_v27, %v1077_v62  ;;  %1902 = vmatmul.mubr.msk.bf16.vlgmr.msra.gmra.mxu0 %vm827_vm3, %v1084_v61 }
 0x3c0   : > { %1915 = vmatprep.mubr.msk.bf16.mxu0 %vm2329_vm0, %v2328_v0  ;;  %1912 = vmatpush3.bf16.msra.mxu0 %v2069_v7 }
 0x3c1   : > { %v1085_v1 = vpack.c.bf16 %v1081_v63, %v1081_v63  ;;  %1913 = vmatprep.subr.bf16.mxu0 %v2328_v0 }
 0x3c3   : > { %1908 = vmatmul.mubr.msk.bf16.vlgmr.msra.gmra.mxu1 %vm827_vm3, %v1085_v1 }
 0x3c4   : > { %1923 = vmatprep.mubr.msk.bf16.mxu1 %vm2329_vm0, %v2328_v0  ;;  %1914 = vmatpush3.bf16.msra.mxu0 %v2070_v8 }
 0x3c5   : > { %1927 = vmatprep.subr.bf16.mxu0 %v2328_v0  ;;  %1920 = vmatpush3.bf16.msra.mxu1 %v2071_v41 }
 0x3c6   : > { %1921 = vmatprep.subr.bf16.mxu1 %v2328_v0 }
 0x413   : > { %v1127_v2 = vpop.f32.mrf.mxu0 }
 0x415   : > { %v1891_v3 = vpop.f32.mrf.mxu0 }
 0x417   : > { %v1130_v4 = vpop.f32.mrf.mxu0 }
 0x419   : > { %v1892_v5 = vpop.f32.mrf.mxu0 }
 0x47b   : > { %v1173_v9 = vpop.f32.mrf.mxu1 }
 0x47c   : > { %1272 = vrot.lane.b32.xlu0 %v1173_v9, %s2337_s5  ;;  %v1794_v9 = vld [vmem:[%s2783_s13] ss:$0 sm:$0xff]  ;;  %s1764_s5 = sshll.u32 %s608_s19, 3 }
 0x47d   : > { %v1897_v10 = vpop.f32.mrf.mxu1  ;;  %s610_s16 = scalar_lea.vmem [#allocation13], %s1764_s5 }
 0x47e   : > { %s1616_s23 = sshll.u32 %s610_s16, 4  ;;  %s1617_s23 = int_to_ptr.vmem [resolvable:$true] %s1616_s23 }
 0x47f   : > { %v1176_v11 = vpop.f32.mrf.mxu1  ;;  %v1219_v12 = vpop.f32.mrf.mxu0 }
 0x480   : > { %1276 = vrot.lane.b32.xlu1 %v1219_v12, %s2338_s30  ;;  %s2233_s30 = scalar_lea.vmem %s1617_s23, 128 }
 0x481   : > { %v1898_v14 = vpop.f32.mrf.mxu1  ;;  %v1903_v15 = vpop.f32.mrf.mxu0  ;;  %p2234_p0 = scmp.ne.s32.totalorder %s1617_s23, %s2233_s30 }
 0x483   : > { %v1222_v16 = vpop.f32.mrf.mxu0  ;;  %v1265_v17 = vpop.f32.mrf.mxu1  ;;  %p2235_p8 = pnand %p2234_p0, %p2823_p2 }
 0x484   : > { %1280 = vrot.lane.b32.xlu0 %v1265_v17, %s2339_s21  ;;  %s2340_s21 = smov [#allocation13]  }
 0x485   : > { %v1904_v18 = vpop.f32.mrf.mxu0  ;;  %v1909_v19 = vpop.f32.mrf.mxu1  ;;  %p2236_p3 = pneg %p2235_p8  ;;  %s2237_s20 = sshll.u32 %s2340_s21, 4  ;;  %s2238_s20 = int_to_ptr.vmem [resolvable:$false] %s2237_s20 }
 0x486   : > { %s2239_s24 = scalar_lea.vmem %s2238_s20, 256  ;;  %p2240_p5 = scmp.lt.s32.totalorder %s1617_s23, %s2238_s20 }
 0x487   : > { %v1268_v20 = vpop.f32.mrf.mxu1  ;;  %p2241_p4 = scmp.lt.s32.totalorder %s2239_s24, %s2233_s30 }
 0x489   : > { %v1910_v21 = vpop.f32.mrf.mxu1  ;;  %p2242_p10 = por %p2241_p4, %p2240_p5 }
 0x48b   : > { %p2243_p11 = pnand %p2242_p10, %p2236_p3 }
 0x4ee   : > { %v1273_v22 = vpop.permute.xlu0 %1272 }
 0x4ef   : > { %v1283_v24 = vsel %vm827_vm3, %v1127_v2, %v1273_v22 }
 0x4f2   : > { %v1277_v23 = vpop.permute.xlu1 %1276 }
 0x4f3   : > { %v1285_v25 = vsel %vm1284_vm6, %v1283_v24, %v1277_v23 }
 0x4f6   : > { %v1281_v26 = vpop.permute.xlu0 %1280 }
 0x4f7   : > { %v1287_v27 = vsel %vm1286_vm7, %v1285_v25, %v1281_v26 }
 0x4f8   : > { %v1288_v28 = vpack.c.bf16 %v1287_v27, %v1287_v27  ;;  %v1803_v27 = vld [vmem:[%s2784_s14] ss:$0 sm:$0xff] }
 0x4fa   : > { %1916 = vmatmul.mubr.msk.bf16.vlgmr.msra.gmra.mxu0 %vm652_vm1, %v1288_v28 }
 0x4fb   : > { %1943 = vmatprep.mubr.msk.bf16.mxu0 %vm2329_vm0, %v2328_v0  ;;  %1928 = vmatpush3.bf16.msra.mxu0 %v2073_v42 }
 0x4fc   : > { %1929 = vmatprep.subr.bf16.mxu0 %v2328_v0 }
 0x4ff   : > { %1930 = vmatpush3.bf16.msra.mxu0 %v2074_v43 }
 0x500   : > { %1931 = vmatprep.subr.bf16.mxu0 %v2328_v0 }
 0x503   : > { %1932 = vmatpush3.bf16.msra.mxu0 %v2075_v54 }
 0x504   : > { %1933 = vmatprep.subr.bf16.mxu0 %v2328_v0 }
 0x507   : > { %1934 = vmatpush3.bf16.msra.mxu0 %v2076_v55 }
 0x508   : > { %1935 = vmatprep.subr.bf16.mxu0 %v2328_v0 }
 0x50b   : > { %1936 = vmatpush3.bf16.msra.mxu0 %v2077_v56 }
 0x50c   : > { %1937 = vmatprep.subr.bf16.mxu0 %v2328_v0 }
 0x50f   : > { %1938 = vmatpush3.bf16.msra.mxu0 %v2078_v57 }
 0x510   : > { %1939 = vmatprep.subr.bf16.mxu0 %v2328_v0 }
 0x513   : > { %1940 = vmatpush3.bf16.msra.mxu0 %v2079_v58 }
 0x514   : > { %1941 = vmatprep.subr.bf16.mxu0 %v2328_v0 }
 0x517   : > { %1942 = vmatpush3.bf16.msra.mxu0 %v2080_v59 }
 0x5ba   : > { %v1349_v30 = vpop.f32.mrf.mxu0 }
 0x5bb   : > { %v1350_v31 = vadd.f32 %v1784_v29, %v1349_v30  ;;  %v1804_v29 = vld [vmem:[%s2785_s15] ss:$0 sm:$0xff] }
 0x5bc   : > { %v1917_v32 = vpop.f32.mrf.mxu0 }
 0x5bd   : > { %v1355_v33 = vadd.f32 %v1350_v31, %v2577_v6  ;;  %v2072_v6 = vld [vmem:[%s2780_s10] sm:$0xff]  }
 0x5be   : > { %v1352_v34 = vpop.f32.mrf.mxu0  ;;  %1922 = vmatpush3.bf16.msra.mxu1 %v2072_v6 }
 0x5bf   : > { %v1358_v35 = vsel %vm652_vm1, %v1355_v33, 0.0 }
 0x5c0   : > { %1359 = vadd.xlane.f32.xlu1 %v1358_v35  ;;  %v1918_v36 = vpop.f32.mrf.mxu0 }
 0x649   : > { %v1360_v37 = vpop.xlane.xlu1 %1359 }
 0x64a   : > { %v1362_v38 = vmul.f32 0.03125, %v1360_v37 }
 0x64c   : > { %v1363_v39 = vsub.f32 %v1355_v33, %v1362_v38 }
 0x64e   : > { %v1364_v13 = vmul.f32 %v1363_v39, %v1363_v39 }
 0x650   : > { %v1365_v40 = vsel %vm652_vm1, %v1364_v13, 0.0 }
 0x651   : > { %1366 = vadd.xlane.f32.xlu0 %v1365_v40 }
 0x6da   : > { %v1367_v44 = vpop.xlane.xlu0 %1366 }
 0x6db   : > { %v1368_v45 = vmul.f32 0.03125, %v1367_v44 }
 0x6dd   : > { %v1369_v46 = vadd.f32 1e-05, %v1368_v45 }
 0x6df   : > { %2097 = vrsqrt.f32 %v1369_v46 }
 0x6ec   : > { %v2098_v47 = vpop.eup %2097 }
 0x6ed   : > { %v1371_v49 = vmul.f32 %v2098_v47, %v1363_v39 }
 0x6ef   : > { %v1378_v51 = vmul.f32 %v1788_v48, %v1371_v49 }
 0x6f1   : > { %v1385_v52 = vadd.f32 %v1789_v50, %v1378_v51 }
 0x6f3   : > { %v1386_v53 = vpack.c.bf16 %v1385_v52, %v1385_v52 }
 0x6f5   : > { %1924 = vmatmul.mubr.msk.bf16.vlgmr.msra.gmra.mxu1 %vm652_vm1, %v1386_v53 }
 0x7b5   : > { %v1447_v61 = vpop.f32.mrf.mxu1 }
 0x7b6   : > { %v1448_v62 = vadd.f32 %v1790_v60, %v1447_v61 }
 0x7b7   : > { %v1925_v63 = vpop.f32.mrf.mxu1 }
 0x7b8   : > { %v1454_v1 = vmul.f32 0.70710677, %v1448_v62  ;;  %v1453_v5 = vmul.f32 0.5, %v1448_v62 }
 0x7b9   : > { %v1450_v2 = vpop.f32.mrf.mxu1 }
 0x7ba   : > { %2099 = verf.f32 %v1454_v1 }
 0x7bb   : > { %v1926_v3 = vpop.f32.mrf.mxu1 }
 0x7c7   : > { %v2100_v4 = vpop.eup %2099 }
 0x7c8   : > { %v1456_v7 = vadd.f32 1.0, %v2100_v4 }
 0x7ca   : > { %v1457_v0 = vmul.f32 %v1456_v7, %v1453_v5 }
 0x7cc   : > { %v1458_v8 = vpack.c.bf16 %v1457_v0, %v1457_v0 }
 0x7ce   : > { %1944 = vmatmul.mubr.bf16.vlgmr.msra.gmra.mxu0 %v1458_v8 }
 0x88e   : > { %v1564_v10 = vpop.f32.mrf.mxu0 }
 0x88f   : > { %v1565_v11 = vadd.f32 %v1794_v9, %v1564_v10 }
 0x890   : > { %v1945_v12 = vpop.f32.mrf.mxu0 }
 0x891   : > { %v1570_v14 = vadd.f32 %v1565_v11, %v1385_v52 }
 0x892   : > { %v1567_v15 = vpop.f32.mrf.mxu0 }
 0x893   : > { %v1573_v16 = vsel %vm652_vm1, %v1570_v14, 0.0 }
 0x894   : > { %1574 = vadd.xlane.f32.xlu0 %v1573_v16  ;;  %v1946_v17 = vpop.f32.mrf.mxu0 }
 0x91d   : > { %v1575_v18 = vpop.xlane.xlu0 %1574 }
 0x91e   : > { %v1576_v19 = vmul.f32 0.03125, %v1575_v18 }
 0x920   : > { %v1577_v20 = vsub.f32 %v1570_v14, %v1576_v19 }
 0x922   : > { %v1578_v21 = vmul.f32 %v1577_v20, %v1577_v20 }
 0x924   : > { %v1579_v22 = vsel %vm652_vm1, %v1578_v21, 0.0 }
 0x925   : > { %1580 = vadd.xlane.f32.xlu1 %v1579_v22 }
 0x9ae   : > { %v1581_v23 = vpop.xlane.xlu1 %1580 }
 0x9af   : > { %v1582_v24 = vmul.f32 0.03125, %v1581_v23 }
 0x9b1   : > { %v1583_v25 = vadd.f32 1e-05, %v1582_v24 }
 0x9b3   : > { %2101 = vrsqrt.f32 %v1583_v25 }
 0x9c0   : > { %v2102_v26 = vpop.eup %2101 }
 0x9c1   : > { %v1585_v28 = vmul.f32 %v2102_v26, %v1577_v20 }
 0x9c3   : > { %v1592_v30 = vmul.f32 %v1803_v27, %v1585_v28 }
 0x9c5   : > { %v1599_v31 = vadd.f32 %v1804_v29, %v1592_v30 }
 0x9c7   : > { %1600 = vst.msk [vmem:[%s610_s16] sm:$0xff] %vm652_vm1, %v1599_v31 }
 0x9c8   : > { %2246 = shalt.err (!%p2243_p11)
}
 0x9c9   : > { %s2247_s5 = scalar_lea.hbm %s1614_s25, 128  ;;  %s2251_s28 = scalar_lea.hbm %s2822_s18, 256 }
 0x9ca   : > { %p2248_p6 = scmp.ne.s32.totalorder %s1614_s25, %s2247_s5  ;;  %p2252_p12 = scmp.lt.s32.totalorder %s1614_s25, %s2822_s18 }
 0x9cb   : > { %p2253_p1 = scmp.lt.s32.totalorder %s2251_s28, %s2247_s5 }
 0x9cc   : > { %p2249_p7 = pnand %p2248_p6, %p2823_p2 }
 0x9cd   : > { %p2254_p13 = por %p2253_p1, %p2252_p12 }
 0x9ce   : > { %p2250_p9 = pneg %p2249_p7 }
 0x9d0   : > { %p2255_p0 = pnand %p2254_p13, %p2250_p9 }
 0x9d2   : > { %2258 = shalt.err (!%p2255_p0)
}
 0x9d3   : > { %1967 = dma.vmem_to_hbm [thread:$0]  (%p2823_p2), %s1617_s23, 128, %s1614_s25, %s1602_s1  }
 0x9d4 PF: > { %s2824_s29 = sld [smem:[#allocation21_spill]] }
 0x9d5   : > { %s2825_s26 = sld [smem:[#allocation18_spill]] }
 0x9d6   : > { %s2826_s30 = sld [smem:[#allocation23_spill]] }
 0x9da   : > { %p1999_p8 = scmp.ge.s32.totalorder %s2824_s29, 2 }
 0x9db   : > { %s1628_s21 = sand.u32 1, %s2825_s26  }
 0x9dc   : > { %p2827_p3 = scmp.ne.s32.totalorder %s2826_s30, 0  ;;  %s1629_s20 = scalar_lea.sflag [#allocation6], %s1628_s21 }
 0x9de   : > { %p1986_p5 = pnand %p1999_p8, %p2827_p3 }
 0x9e0   : > { %p1987_p4 = pneg %p1986_p5 }
 0x9e2   : > { %2296 = dma.done.wait (%p1987_p4), %s1629_s20, 128  }
 0x9e3   : > { %2298 = vsyncadd (%p1987_p4), %s1629_s20, 4294967168  ;;  %s32_s26 = sadd.s32 1, %s2824_s29   ;;  %s2828_s24 = sld [smem:[#allocation19_spill]] }
 0x9e4   : > { %p29_p10 = scmp.ge.s32.totalorder %s32_s26, 4   ;;  %s2829_s23 = sld [smem:[#allocation24_spill]] }
 0x9e5   : > { %s2830_s0 = sld [smem:[#allocation20_spill]]  ;;  %s2832_s21 = smov %s2305_s22 }
 0x9e6   : > { %s2831_s25 = sld [smem:[#allocation22_spill]] }
 0x9e7   :  { %31 = sbr.rel (!%p29_p10) target bundleno = 12 (0xc), region = 153 }
 0x9e9   : > { %s2833_s22 = smov %s2828_s24 }
 0x9eb   : > { %s2834_s24 = smov %s2830_s0 }
 0x9ec   :  { %1634 = vsyncpa [#allocation5], 1 }
 0x9ed   :  { %1636 = vsyncpa [#allocation5 + $0x1], 1 }
 0x9ee   :  { %1637 = vsyncpa [#allocation8], 1 }
 0x9ef   :  { %1638 = vsyncpa [#allocation11], 1 }
 0x9f0   :  { %1639 = vsyncpa [#allocation6], 1 }
 0x9f1   :  { %1641 = vsyncpa [#allocation6 + $0x1], 1 }

</bundles_post_ra>
